<compile_context>
chip_gen: v7x
topology: tpu7x:2x2x1
jax: 0.10.0
libtpu: 0.0.40
codegen_flags: <defaults>
</compile_context>

<pallas_src>
import functools

import jax
import jax.numpy as jnp
from jax import lax
from jax.experimental import pallas as pl
from jax.experimental.pallas import tpu as pltpu


# ----------------------------- Pallas kernel -------------------------------

def _mmoe_kernel(uid_ref, iid_ref,                     # scalar prefetch (SMEM, full (B,))
                 dense_ref,                            # (block_b, num_dense) VMEM
                 utab_ref, itab_ref,                   # embedding tables, HBM (pl.ANY)
                 ew1_ref, eb1_ref, ew2_ref, eb2_ref,   # fused experts
                 gw_ref, gb_ref, exp_ref, red_ref,     # fused gates + mixture mats
                 tw1_ref, tb1_ref, tw2_ref, tb2_ref, tw3_ref, tb3_ref,  # towers
                 out_ref,                              # (num_tasks, block_b) lane-dense
                 ubuf, ibuf, sem,                      # scratch (VMEM, VMEM, DMA sems)
                 *, num_experts, num_tasks, emb_dim, num_dense,
                 block_b, matmul_dtype):
    f32 = jnp.float32
    E = num_experts
    base = pl.program_id(0) * block_b

    # ---- fused embedding gather: per-row DMA from the HBM tables ----------
    # TODO(synk): for block_b >= 128 use a pl.loop over rows (fewer sems) and
    # prefetch the next batch block's rows behind the current block's compute.
    copies = []
    for r in range(block_b):
        cu = pltpu.make_async_copy(utab_ref.at[pl.ds(uid_ref[base + r], 1)],
                                   ubuf.at[pl.ds(r, 1)], sem.at[0, r])
        ci = pltpu.make_async_copy(itab_ref.at[pl.ds(iid_ref[base + r], 1)],
                                   ibuf.at[pl.ds(r, 1)], sem.at[1, r])
        cu.start()
        ci.start()
        copies.append(cu)
        copies.append(ci)
    for c in copies:
        c.wait()

    u_emb = ubuf[...].astype(matmul_dtype)             # (block_b, emb)
    i_emb = ibuf[...].astype(matmul_dtype)              # (block_b, emb)
    dense = dense_ref[...].astype(matmul_dtype)          # (block_b, num_dense)

    d0, d1 = emb_dim, 2 * emb_dim

    def xw(w_ref, b_ref):
        # features = [u_emb | i_emb | dense]; K-split avoids an in-kernel concat.
        acc = (jnp.dot(u_emb, w_ref[0:d0, :], preferred_element_type=f32)
               + jnp.dot(i_emb, w_ref[d0:d1, :], preferred_element_type=f32))
        if num_dense > 0:
            acc = acc + jnp.dot(dense, w_ref[d1:d1 + num_dense, :],
                                preferred_element_type=f32)
        return acc + b_ref[...]

    # ---- experts: one wide matmul + one block-diagonal matmul --------------
    # (valid only while E*H1 <= 128 and E*H2 <= 128 -- one MXU tile)
    h = jnp.maximum(xw(ew1_ref, eb1_ref), 0.0).astype(matmul_dtype)    # (B, E*H1)
    expert_flat = jnp.maximum(
        jnp.dot(h, ew2_ref[...], preferred_element_type=f32) + eb2_ref[...],
        0.0)                                                           # (B, E*H2)

    # ---- gates: all tasks in one matmul ------------------------------------
    logits_all = xw(gw_ref, gb_ref)                                    # (B, T*E)

    rows = []
    # TODO(synk): for num_tasks >= 8 fold tasks into the stacked lane dim (or
    # lax.fori_loop) instead of unrolling, to bound code size / vreg pressure.
    for t in range(num_tasks):
        # per-task softmax (max-stabilized, exact division)
        lg = logits_all[:, t * E:(t + 1) * E]                          # (B, E)
        lg = lg - jnp.max(lg, axis=-1, keepdims=True)
        p = jnp.exp(lg)
        gate_t = p / jnp.sum(p, axis=-1, keepdims=True)                # (B, E)

        # mixture: broadcast-expand the gates, multiply, segment-reduce over
        # experts.  Fine while E*H2 <= 128 (single MXU tile).
        gate_exp = jnp.dot(gate_t.astype(matmul_dtype), exp_ref[...],
                           preferred_element_type=f32)                 # (B, E*H2)
        task_in = jnp.dot((gate_exp * expert_flat).astype(matmul_dtype),
                          red_ref[...], preferred_element_type=f32)    # (B, H2)

        # tower hidden layers (MXU) + ReLU
        th = jnp.maximum(jnp.dot(task_in.astype(matmul_dtype), tw1_ref[t],
                                 preferred_element_type=f32) + tb1_ref[t], 0.0)
        th = jnp.maximum(jnp.dot(th.astype(matmul_dtype), tw2_ref[t],
                                 preferred_element_type=f32) + tb2_ref[t], 0.0)

        # output projection (out_dim=1): w3_row(1,t2) . th^T -> (1, block_b).
        # Expressed as dot_general with trans_b so the prediction lands with
        # batch on the lane axis (lane-dense output row), no explicit transpose.
        pred = lax.dot_general(tw3_ref[t], th.astype(matmul_dtype),
                               (((1,), (1,)), ((), ())),
                               preferred_element_type=f32) + tb3_ref[t]  # (1, block_b)
        rows.append(pred)

    out_ref[...] = jnp.concatenate(rows, axis=0)   # single lane-dense (T, block_b) store


# ----------------------------- wrapper --------------------------------------

def mmoe_pallas_forward(user_ids, item_ids, dense_features, user_table, item_table,
                        fused_params, *, num_experts, num_tasks, emb_dim, num_dense,
                        block_b=None, matmul_dtype=jnp.float32):
    B = int(user_ids.shape[0])
    if block_b is None:
        # 256 saturates v6e/v7x's 2x256 MXU rows; 128 fills v5e's 4x128 MXU.
        block_b = min(B, 256)
    assert B % block_b == 0, (B, block_b)
    assert num_dense >= 1  # TODO(synk): support the zero-dense-feature variant.

    (ew1_all, eb1_all, ew2_bd, eb2_all, gw_all, gb_all, exp_mat, red_mat,
     tw1, tb1, tw2, tb2, tw3, tb3) = fused_params

    # single-tile guards for the fused experts / mixture matmuls (see review)
    EH1, EH2 = ew1_all.shape[1], ew2_bd.shape[1]
    assert EH1 <= 128 and EH2 <= 128, \
        "block-diag / kron fusion only valid within one 128-lane MXU tile"

    cast = lambda w: w.astype(matmul_dtype)       # matmul operands only
    weights = (cast(ew1_all), eb1_all, cast(ew2_bd), eb2_all,
               cast(gw_all), gb_all, cast(exp_mat), cast(red_mat),
               cast(tw1), tb1, cast(tw2), tb2, cast(tw3), tb3)

    def resident(x):
        # full-shape block, constant index_map -> stays VMEM-resident across grid
        nd = x.ndim
        return pl.BlockSpec(x.shape, lambda i, uid, iid, _nd=nd: (0,) * _nd)

    in_specs = (
        [pl.BlockSpec((block_b, num_dense), lambda i, uid, iid: (i, 0)),
         pl.BlockSpec(memory_space=pl.ANY),     # user table stays in HBM
         pl.BlockSpec(memory_space=pl.ANY)]     # item table stays in HBM
        + [resident(w) for w in weights])
    out_specs = pl.BlockSpec((num_tasks, block_b), lambda i, uid, iid: (0, i))

    kernel = functools.partial(
        _mmoe_kernel,
        num_experts=num_experts, num_tasks=num_tasks, emb_dim=emb_dim,
        num_dense=num_dense, block_b=block_b, matmul_dtype=matmul_dtype)

    D_in, TE = ew1_all.shape[0], gw_all.shape[1]
    H2, t1, t2 = red_mat.shape[1], tw1.shape[2], tw2.shape[2]
    flops = 2 * B * (D_in * EH1 + EH1 * EH2 + D_in * TE
                     + num_tasks * (num_experts * EH2 + EH2 * H2
                                    + H2 * t1 + t1 * t2 + t2))
    bytes_accessed = (B * (2 * 4 + (2 * emb_dim + num_dense + num_tasks) * 4)
                      + sum(int(w.size) * w.dtype.itemsize for w in weights))

    out = pl.pallas_call(
        kernel,
        out_shape=jax.ShapeDtypeStruct((num_tasks, B), jnp.float32),
        grid_spec=pltpu.PrefetchScalarGridSpec(
            num_scalar_prefetch=2,
            grid=(B // block_b,),
            in_specs=in_specs,
            out_specs=out_specs,
            scratch_shapes=[pltpu.VMEM((block_b, emb_dim), jnp.float32),
                            pltpu.VMEM((block_b, emb_dim), jnp.float32),
                            pltpu.SemaphoreType.DMA((2, block_b))]),
        compiler_params=pltpu.CompilerParams(
            dimension_semantics=("parallel",),        # megacore-shard the batch
            vmem_limit_bytes=32 * 1024 * 1024),       # above v5e's 16 MiB default
        cost_estimate=pl.CostEstimate(
            flops=int(flops),
            transcendentals=int(B * num_tasks * num_experts),
            bytes_accessed=int(bytes_accessed)),
    )(user_ids.astype(jnp.int32).reshape(B),
      item_ids.astype(jnp.int32).reshape(B),
      dense_features.astype(jnp.float32),
      user_table, item_table, *weights)

    return [out[t].reshape(B, 1) for t in range(num_tasks)]


# ------------------------ parameter init + fusion ----------------------------

def _linear_init(key, fan_in, fan_out):
    """PyTorch-style U(-1/sqrt(fan_in), 1/sqrt(fan_in)), (in, out) layout."""
    kw, kb = jax.random.split(key)
    bound = 1.0 / jnp.sqrt(jnp.float32(fan_in))
    w = jax.random.uniform(kw, (fan_in, fan_out), jnp.float32, -bound, bound)
    b = jax.random.uniform(kb, (fan_out,), jnp.float32, -bound, bound)
    return w, b


def init_raw_params(key, *, input_dim, num_experts, num_tasks,
                    expert_hidden_dims, tower_hidden_dims):
    h1, h2 = expert_hidden_dims
    t1, t2 = tower_hidden_dims
    keys = iter(jax.random.split(key, 2 * num_experts + num_tasks + 3 * num_tasks))
    experts = [(_linear_init(next(keys), input_dim, h1),
                _linear_init(next(keys), h1, h2)) for _ in range(num_experts)]
    gates = [_linear_init(next(keys), input_dim, num_experts) for _ in range(num_tasks)]
    towers = [(_linear_init(next(keys), h2, t1),
               _linear_init(next(keys), t1, t2),
               _linear_init(next(keys), t2, 1)) for _ in range(num_tasks)]
    return experts, gates, towers


def fuse_params(experts, gates, towers):
    f32 = jnp.float32
    E = len(experts)
    h1 = experts[0][0][0].shape[1]
    h2 = experts[0][1][0].shape[1]

    # experts: wide first layer + block-diagonal second layer
    ew1_all = jnp.concatenate([w1 for (w1, _), _ in experts], axis=1)      # (D_in, E*H1)
    eb1_all = jnp.concatenate([b1 for (_, b1), _ in experts])[None, :]     # (1, E*H1)
    ew2_bd = jnp.zeros((E * h1, E * h2), f32)
    for e, (_, (w2, _)) in enumerate(experts):
        ew2_bd = ew2_bd.at[e * h1:(e + 1) * h1, e * h2:(e + 1) * h2].set(w2)
    eb2_all = jnp.concatenate([b2 for _, (_, b2) in experts])[None, :]     # (1, E*H2)

    # gates: all tasks stacked along the output dim
    gw_all = jnp.concatenate([w for w, _ in gates], axis=1)                # (D_in, T*E)
    gb_all = jnp.concatenate([b for _, b in gates])[None, :]               # (1, T*E)

    # structured mixture matrices: expand (E -> E*H2) and segment-reduce (E*H2 -> H2)
    exp_mat = jnp.kron(jnp.eye(E, dtype=f32), jnp.ones((1, h2), f32))      # (E, E*H2)
    red_mat = jnp.kron(jnp.ones((E, 1), f32), jnp.eye(h2, dtype=f32))      # (E*H2, H2)

    # towers (stacked per task); output projection stored as a row (used with trans_b)
    tw1 = jnp.stack([w1 for (w1, _), _, _ in towers])
    tb1 = jnp.stack([b1[None, :] for (_, b1), _, _ in towers])
    tw2 = jnp.stack([w2 for _, (w2, _), _ in towers])
    tb2 = jnp.stack([b2[None, :] for _, (_, b2), _ in towers])
    tw3 = jnp.stack([w3.T for _, _, (w3, _) in towers])                    # (T, 1, t2)
    tb3 = jnp.stack([b3[None, :] for _, _, (_, b3) in towers])             # (T, 1, 1)

    return (ew1_all, eb1_all, ew2_bd, eb2_all, gw_all, gb_all, exp_mat, red_mat,
            tw1, tb1, tw2, tb2, tw3, tb3)


# ------------------------ pure-JAX reference (for checking) -----------------

def mmoe_reference(user_ids, item_ids, dense, user_table, item_table,
                   experts, gates, towers):
    x = jnp.concatenate([user_table[user_ids], item_table[item_ids], dense], axis=-1)
    eo = []
    for (w1, b1), (w2, b2) in experts:
        h = jnp.maximum(x @ w1 + b1, 0.0)
        h = jnp.maximum(h @ w2 + b2, 0.0)
        eo.append(h)
    eo = jnp.stack(eo, axis=1)                                  # (B, E, H2)
    preds = []
    for t in range(len(towers)):
        gw, gb = gates[t]
        g = jax.nn.softmax(x @ gw + gb, axis=-1)                # (B, E)
        ti = jnp.sum(eo * g[:, :, None], axis=1)                # (B, H2)
        (w1, b1), (w2, b2), (w3, b3) = towers[t]
        h = jnp.maximum(ti @ w1 + b1, 0.0)
        h = jnp.maximum(h @ w2 + b2, 0.0)
        preds.append(h @ w3 + b3)
    return preds


# --------------------------------- main --------------------------------------

if __name__ == "__main__":
    user_cardinality = 32
    item_cardinality = 64
    embedding_dim = 16
    num_dense_features = 4
    num_experts = 3
    num_tasks = 2
    expert_hidden_dims = [32, 16]
    tower_hidden_dims = [16, 8]
    batch = 8

    input_dim = 2 * embedding_dim + num_dense_features  # 36

    root = jax.random.PRNGKey(0)
    k_emb_u, k_emb_i, k_ids_u, k_ids_i, k_dense, k_params = jax.random.split(root, 6)

    user_table = jax.random.normal(k_emb_u, (user_cardinality, embedding_dim), jnp.float32)
    item_table = jax.random.normal(k_emb_i, (item_cardinality, embedding_dim), jnp.float32)
    user_ids = jax.random.randint(k_ids_u, (batch,), 0, user_cardinality)
    item_ids = jax.random.randint(k_ids_i, (batch,), 0, item_cardinality)
    dense_features = jax.random.normal(k_dense, (batch, num_dense_features), jnp.float32)

    experts, gates, towers = init_raw_params(
        k_params, input_dim=input_dim, num_experts=num_experts, num_tasks=num_tasks,
        expert_hidden_dims=expert_hidden_dims, tower_hidden_dims=tower_hidden_dims)
    fused = fuse_params(experts, gates, towers)

    ref = mmoe_reference(user_ids, item_ids, dense_features, user_table, item_table,
                         experts, gates, towers)

    # --- f32 MXU operands: tight check against the reference ---------------
    preds = mmoe_pallas_forward(user_ids, item_ids, dense_features,
                                user_table, item_table, fused,
                                num_experts=num_experts, num_tasks=num_tasks,
                                emb_dim=embedding_dim, num_dense=num_dense_features,
                                matmul_dtype=jnp.float32)
    preds = [jax.block_until_ready(p) for p in preds]
    for p, r in zip(preds, ref):
        assert p.shape == (batch, 1), p.shape
        assert jnp.allclose(p, r, atol=1e-2, rtol=1e-2), \
            float(jnp.max(jnp.abs(p - r)))

    # --- bf16 MXU operands (v5e/v6e/v7x throughput path): loose sanity check -
    preds_bf16 = mmoe_pallas_forward(user_ids, item_ids, dense_features,
                                     user_table, item_table, fused,
                                     num_experts=num_experts, num_tasks=num_tasks,
                                     emb_dim=embedding_dim, num_dense=num_dense_features,
                                     matmul_dtype=jnp.bfloat16)
    preds_bf16 = [jax.block_until_ready(p) for p in preds_bf16]
    for p, r in zip(preds_bf16, ref):
        assert p.shape == (batch, 1), p.shape
        assert bool(jnp.all(jnp.isfinite(p)))
        assert jnp.allclose(p, r, atol=1e-1, rtol=1e-1), \
            float(jnp.max(jnp.abs(p - r)))

    print("KERNEL_OK")
</pallas_src>

<mosaic_0001>
module attributes {stable_mosaic.version = 11 : i64} {
  func.func @_mmoe_kernel(%arg0: i32, %arg1: memref<8xi32, #tpu.memory_space<smem>>, %arg2: memref<8xi32, #tpu.memory_space<smem>>, %arg3: memref<8x4xf32, #tpu.memory_space<vmem>>, %arg4: memref<32x16xf32, #tpu.memory_space<any>>, %arg5: memref<64x16xf32, #tpu.memory_space<any>>, %arg6: memref<36x96xf32, #tpu.memory_space<vmem>>, %arg7: memref<1x96xf32, #tpu.memory_space<vmem>>, %arg8: memref<96x48xf32, #tpu.memory_space<vmem>>, %arg9: memref<1x48xf32, #tpu.memory_space<vmem>>, %arg10: memref<36x6xf32, #tpu.memory_space<vmem>>, %arg11: memref<1x6xf32, #tpu.memory_space<vmem>>, %arg12: memref<3x48xf32, #tpu.memory_space<vmem>>, %arg13: memref<48x16xf32, #tpu.memory_space<vmem>>, %arg14: memref<2x16x16xf32, #tpu.memory_space<vmem>>, %arg15: memref<2x1x16xf32, #tpu.memory_space<vmem>>, %arg16: memref<2x16x8xf32, #tpu.memory_space<vmem>>, %arg17: memref<2x1x8xf32, #tpu.memory_space<vmem>>, %arg18: memref<2x1x8xf32, #tpu.memory_space<vmem>>, %arg19: memref<2x1x1xf32, #tpu.memory_space<vmem>>, %arg20: memref<2x8xf32, #tpu.memory_space<vmem>>, %arg21: memref<8x16xf32, #tpu.memory_space<vmem>>, %arg22: memref<8x16xf32, #tpu.memory_space<vmem>>, %arg23: memref<2x8x!tpu.dma_semaphore, #tpu.memory_space<semaphore_mem>>) attributes {dimension_semantics = [#tpu.dimension_semantics<parallel>], iteration_bounds = array<i64: 1>, scalar_prefetch = 2 : i64, scratch_operands = 3 : i64, tpu.core_type = #tpu.core_type<tc>, window_params = [{transform_indices = @transform_0, window_bounds = array<i64: 8, 4>}, {}, {}, {pipeline_mode = #tpu.pipeline_mode<synchronous>, transform_indices = @transform_3, window_bounds = array<i64: 36, 96>}, {pipeline_mode = #tpu.pipeline_mode<synchronous>, transform_indices = @transform_4, window_bounds = array<i64: 1, 96>}, {pipeline_mode = #tpu.pipeline_mode<synchronous>, transform_indices = @transform_5, window_bounds = array<i64: 96, 48>}, {pipeline_mode = #tpu.pipeline_mode<synchronous>, transform_indices = @transform_6, window_bounds = array<i64: 1, 48>}, {pipeline_mode = #tpu.pipeline_mode<synchronous>, transform_indices = @transform_7, window_bounds = array<i64: 36, 6>}, {pipeline_mode = #tpu.pipeline_mode<synchronous>, transform_indices = @transform_8, window_bounds = array<i64: 1, 6>}, {pipeline_mode = #tpu.pipeline_mode<synchronous>, transform_indices = @transform_9, window_bounds = array<i64: 3, 48>}, {pipeline_mode = #tpu.pipeline_mode<synchronous>, transform_indices = @transform_10, window_bounds = array<i64: 48, 16>}, {pipeline_mode = #tpu.pipeline_mode<synchronous>, transform_indices = @transform_11, window_bounds = array<i64: 2, 16, 16>}, {pipeline_mode = #tpu.pipeline_mode<synchronous>, transform_indices = @transform_12, window_bounds = array<i64: 2, 1, 16>}, {pipeline_mode = #tpu.pipeline_mode<synchronous>, transform_indices = @transform_13, window_bounds = array<i64: 2, 16, 8>}, {pipeline_mode = #tpu.pipeline_mode<synchronous>, transform_indices = @transform_14, window_bounds = array<i64: 2, 1, 8>}, {pipeline_mode = #tpu.pipeline_mode<synchronous>, transform_indices = @transform_15, window_bounds = array<i64: 2, 1, 8>}, {pipeline_mode = #tpu.pipeline_mode<synchronous>, transform_indices = @transform_16, window_bounds = array<i64: 2, 1, 1>}, {transform_indices = @transform_17, window_bounds = array<i64: 2, 8>}]} {
    %c8_i32 = arith.constant 8 : i32
    %0 = arith.muli %arg0, %c8_i32 : i32
    %c0_i32 = arith.constant 0 : i32
    %1 = arith.addi %0, %c0_i32 : i32
    %2 = arith.index_cast %1 : i32 to index
    %3 = memref.load %arg1[%2] : memref<8xi32, #tpu.memory_space<smem>>
    %c0_i32_0 = arith.constant 0 : i32
    %4 = arith.addi %0, %c0_i32_0 : i32
    %5 = arith.index_cast %4 : i32 to index
    %6 = memref.load %arg2[%5] : memref<8xi32, #tpu.memory_space<smem>>
    %c0_i32_1 = arith.constant 0 : i32
    %c0_i32_2 = arith.constant 0 : i32
    %c0_i32_3 = arith.constant 0 : i32
    %7 = tpu.memref_slice %arg4[%3, %c0_i32_3] : memref<32x16xf32, #tpu.memory_space<any>> -> memref<1x16xf32, #tpu.memory_space<any>>
    %c0_i32_4 = arith.constant 0 : i32
    %c0_i32_5 = arith.constant 0 : i32
    %8 = tpu.memref_slice %arg21[%c0_i32_4, %c0_i32_5] : memref<8x16xf32, #tpu.memory_space<vmem>> -> memref<1x16xf32, #tpu.memory_space<vmem>>
    %9 = tpu.memref_slice %arg23[%c0_i32_1, %c0_i32_2] : memref<2x8x!tpu.dma_semaphore, #tpu.memory_space<semaphore_mem>> -> memref<1x1x!tpu.dma_semaphore, #tpu.memory_space<semaphore_mem>>
    %10 = tpu.memref_squeeze %9 : memref<1x1x!tpu.dma_semaphore, #tpu.memory_space<semaphore_mem>> -> memref<!tpu.dma_semaphore, #tpu.memory_space<semaphore_mem>>
    tpu.enqueue_dma source(%7 : memref<1x16xf32, #tpu.memory_space<any>>) target(%8 : memref<1x16xf32, #tpu.memory_space<vmem>>) target_semaphore(%10 : memref<!tpu.dma_semaphore, #tpu.memory_space<semaphore_mem>>)
    %c1_i32 = arith.constant 1 : i32
    %c0_i32_6 = arith.constant 0 : i32
    %c0_i32_7 = arith.constant 0 : i32
    %11 = tpu.memref_slice %arg5[%6, %c0_i32_7] : memref<64x16xf32, #tpu.memory_space<any>> -> memref<1x16xf32, #tpu.memory_space<any>>
    %c0_i32_8 = arith.constant 0 : i32
    %c0_i32_9 = arith.constant 0 : i32
    %12 = tpu.memref_slice %arg22[%c0_i32_8, %c0_i32_9] : memref<8x16xf32, #tpu.memory_space<vmem>> -> memref<1x16xf32, #tpu.memory_space<vmem>>
    %13 = tpu.memref_slice %arg23[%c1_i32, %c0_i32_6] : memref<2x8x!tpu.dma_semaphore, #tpu.memory_space<semaphore_mem>> -> memref<1x1x!tpu.dma_semaphore, #tpu.memory_space<semaphore_mem>>
    %14 = tpu.memref_squeeze %13 : memref<1x1x!tpu.dma_semaphore, #tpu.memory_space<semaphore_mem>> -> memref<!tpu.dma_semaphore, #tpu.memory_space<semaphore_mem>>
    tpu.enqueue_dma source(%11 : memref<1x16xf32, #tpu.memory_space<any>>) target(%12 : memref<1x16xf32, #tpu.memory_space<vmem>>) target_semaphore(%14 : memref<!tpu.dma_semaphore, #tpu.memory_space<semaphore_mem>>)
    %c1_i32_10 = arith.constant 1 : i32
    %15 = arith.addi %0, %c1_i32_10 : i32
    %16 = arith.index_cast %15 : i32 to index
    %17 = memref.load %arg1[%16] : memref<8xi32, #tpu.memory_space<smem>>
    %c1_i32_11 = arith.constant 1 : i32
    %18 = arith.addi %0, %c1_i32_11 : i32
    %19 = arith.index_cast %18 : i32 to index
    %20 = memref.load %arg2[%19] : memref<8xi32, #tpu.memory_space<smem>>
    %c0_i32_12 = arith.constant 0 : i32
    %c1_i32_13 = arith.constant 1 : i32
    %c0_i32_14 = arith.constant 0 : i32
    %21 = tpu.memref_slice %arg4[%17, %c0_i32_14] : memref<32x16xf32, #tpu.memory_space<any>> -> memref<1x16xf32, #tpu.memory_space<any>>
    %c1_i32_15 = arith.constant 1 : i32
    %c0_i32_16 = arith.constant 0 : i32
    %22 = tpu.memref_slice %arg21[%c1_i32_15, %c0_i32_16] : memref<8x16xf32, #tpu.memory_space<vmem>> -> memref<1x16xf32, #tpu.memory_space<vmem>>
    %23 = tpu.memref_slice %arg23[%c0_i32_12, %c1_i32_13] : memref<2x8x!tpu.dma_semaphore, #tpu.memory_space<semaphore_mem>> -> memref<1x1x!tpu.dma_semaphore, #tpu.memory_space<semaphore_mem>>
    %24 = tpu.memref_squeeze %23 : memref<1x1x!tpu.dma_semaphore, #tpu.memory_space<semaphore_mem>> -> memref<!tpu.dma_semaphore, #tpu.memory_space<semaphore_mem>>
    tpu.enqueue_dma source(%21 : memref<1x16xf32, #tpu.memory_space<any>>) target(%22 : memref<1x16xf32, #tpu.memory_space<vmem>>) target_semaphore(%24 : memref<!tpu.dma_semaphore, #tpu.memory_space<semaphore_mem>>)
    %c1_i32_17 = arith.constant 1 : i32
    %c1_i32_18 = arith.constant 1 : i32
    %c0_i32_19 = arith.constant 0 : i32
    %25 = tpu.memref_slice %arg5[%20, %c0_i32_19] : memref<64x16xf32, #tpu.memory_space<any>> -> memref<1x16xf32, #tpu.memory_space<any>>
    %c1_i32_20 = arith.constant 1 : i32
    %c0_i32_21 = arith.constant 0 : i32
    %26 = tpu.memref_slice %arg22[%c1_i32_20, %c0_i32_21] : memref<8x16xf32, #tpu.memory_space<vmem>> -> memref<1x16xf32, #tpu.memory_space<vmem>>
    %27 = tpu.memref_slice %arg23[%c1_i32_17, %c1_i32_18] : memref<2x8x!tpu.dma_semaphore, #tpu.memory_space<semaphore_mem>> -> memref<1x1x!tpu.dma_semaphore, #tpu.memory_space<semaphore_mem>>
    %28 = tpu.memref_squeeze %27 : memref<1x1x!tpu.dma_semaphore, #tpu.memory_space<semaphore_mem>> -> memref<!tpu.dma_semaphore, #tpu.memory_space<semaphore_mem>>
    tpu.enqueue_dma source(%25 : memref<1x16xf32, #tpu.memory_space<any>>) target(%26 : memref<1x16xf32, #tpu.memory_space<vmem>>) target_semaphore(%28 : memref<!tpu.dma_semaphore, #tpu.memory_space<semaphore_mem>>)
    %c2_i32 = arith.constant 2 : i32
    %29 = arith.addi %0, %c2_i32 : i32
    %30 = arith.index_cast %29 : i32 to index
    %31 = memref.load %arg1[%30] : memref<8xi32, #tpu.memory_space<smem>>
    %c2_i32_22 = arith.constant 2 : i32
    %32 = arith.addi %0, %c2_i32_22 : i32
    %33 = arith.index_cast %32 : i32 to index
    %34 = memref.load %arg2[%33] : memref<8xi32, #tpu.memory_space<smem>>
    %c0_i32_23 = arith.constant 0 : i32
    %c2_i32_24 = arith.constant 2 : i32
    %c0_i32_25 = arith.constant 0 : i32
    %35 = tpu.memref_slice %arg4[%31, %c0_i32_25] : memref<32x16xf32, #tpu.memory_space<any>> -> memref<1x16xf32, #tpu.memory_space<any>>
    %c2_i32_26 = arith.constant 2 : i32
    %c0_i32_27 = arith.constant 0 : i32
    %36 = tpu.memref_slice %arg21[%c2_i32_26, %c0_i32_27] : memref<8x16xf32, #tpu.memory_space<vmem>> -> memref<1x16xf32, #tpu.memory_space<vmem>>
    %37 = tpu.memref_slice %arg23[%c0_i32_23, %c2_i32_24] : memref<2x8x!tpu.dma_semaphore, #tpu.memory_space<semaphore_mem>> -> memref<1x1x!tpu.dma_semaphore, #tpu.memory_space<semaphore_mem>>
    %38 = tpu.memref_squeeze %37 : memref<1x1x!tpu.dma_semaphore, #tpu.memory_space<semaphore_mem>> -> memref<!tpu.dma_semaphore, #tpu.memory_space<semaphore_mem>>
    tpu.enqueue_dma source(%35 : memref<1x16xf32, #tpu.memory_space<any>>) target(%36 : memref<1x16xf32, #tpu.memory_space<vmem>>) target_semaphore(%38 : memref<!tpu.dma_semaphore, #tpu.memory_space<semaphore_mem>>)
    %c1_i32_28 = arith.constant 1 : i32
    %c2_i32_29 = arith.constant 2 : i32
    %c0_i32_30 = arith.constant 0 : i32
    %39 = tpu.memref_slice %arg5[%34, %c0_i32_30] : memref<64x16xf32, #tpu.memory_space<any>> -> memref<1x16xf32, #tpu.memory_space<any>>
    %c2_i32_31 = arith.constant 2 : i32
    %c0_i32_32 = arith.constant 0 : i32
    %40 = tpu.memref_slice %arg22[%c2_i32_31, %c0_i32_32] : memref<8x16xf32, #tpu.memory_space<vmem>> -> memref<1x16xf32, #tpu.memory_space<vmem>>
    %41 = tpu.memref_slice %arg23[%c1_i32_28, %c2_i32_29] : memref<2x8x!tpu.dma_semaphore, #tpu.memory_space<semaphore_mem>> -> memref<1x1x!tpu.dma_semaphore, #tpu.memory_space<semaphore_mem>>
    %42 = tpu.memref_squeeze %41 : memref<1x1x!tpu.dma_semaphore, #tpu.memory_space<semaphore_mem>> -> memref<!tpu.dma_semaphore, #tpu.memory_space<semaphore_mem>>
    tpu.enqueue_dma source(%39 : memref<1x16xf32, #tpu.memory_space<any>>) target(%40 : memref<1x16xf32, #tpu.memory_space<vmem>>) target_semaphore(%42 : memref<!tpu.dma_semaphore, #tpu.memory_space<semaphore_mem>>)
    %c3_i32 = arith.constant 3 : i32
    %43 = arith.addi %0, %c3_i32 : i32
    %44 = arith.index_cast %43 : i32 to index
    %45 = memref.load %arg1[%44] : memref<8xi32, #tpu.memory_space<smem>>
    %c3_i32_33 = arith.constant 3 : i32
    %46 = arith.addi %0, %c3_i32_33 : i32
    %47 = arith.index_cast %46 : i32 to index
    %48 = memref.load %arg2[%47] : memref<8xi32, #tpu.memory_space<smem>>
    %c0_i32_34 = arith.constant 0 : i32
    %c3_i32_35 = arith.constant 3 : i32
    %c0_i32_36 = arith.constant 0 : i32
    %49 = tpu.memref_slice %arg4[%45, %c0_i32_36] : memref<32x16xf32, #tpu.memory_space<any>> -> memref<1x16xf32, #tpu.memory_space<any>>
    %c3_i32_37 = arith.constant 3 : i32
    %c0_i32_38 = arith.constant 0 : i32
    %50 = tpu.memref_slice %arg21[%c3_i32_37, %c0_i32_38] : memref<8x16xf32, #tpu.memory_space<vmem>> -> memref<1x16xf32, #tpu.memory_space<vmem>>
    %51 = tpu.memref_slice %arg23[%c0_i32_34, %c3_i32_35] : memref<2x8x!tpu.dma_semaphore, #tpu.memory_space<semaphore_mem>> -> memref<1x1x!tpu.dma_semaphore, #tpu.memory_space<semaphore_mem>>
    %52 = tpu.memref_squeeze %51 : memref<1x1x!tpu.dma_semaphore, #tpu.memory_space<semaphore_mem>> -> memref<!tpu.dma_semaphore, #tpu.memory_space<semaphore_mem>>
    tpu.enqueue_dma source(%49 : memref<1x16xf32, #tpu.memory_space<any>>) target(%50 : memref<1x16xf32, #tpu.memory_space<vmem>>) target_semaphore(%52 : memref<!tpu.dma_semaphore, #tpu.memory_space<semaphore_mem>>)
    %c1_i32_39 = arith.constant 1 : i32
    %c3_i32_40 = arith.constant 3 : i32
    %c0_i32_41 = arith.constant 0 : i32
    %53 = tpu.memref_slice %arg5[%48, %c0_i32_41] : memref<64x16xf32, #tpu.memory_space<any>> -> memref<1x16xf32, #tpu.memory_space<any>>
    %c3_i32_42 = arith.constant 3 : i32
    %c0_i32_43 = arith.constant 0 : i32
    %54 = tpu.memref_slice %arg22[%c3_i32_42, %c0_i32_43] : memref<8x16xf32, #tpu.memory_space<vmem>> -> memref<1x16xf32, #tpu.memory_space<vmem>>
    %55 = tpu.memref_slice %arg23[%c1_i32_39, %c3_i32_40] : memref<2x8x!tpu.dma_semaphore, #tpu.memory_space<semaphore_mem>> -> memref<1x1x!tpu.dma_semaphore, #tpu.memory_space<semaphore_mem>>
    %56 = tpu.memref_squeeze %55 : memref<1x1x!tpu.dma_semaphore, #tpu.memory_space<semaphore_mem>> -> memref<!tpu.dma_semaphore, #tpu.memory_space<semaphore_mem>>
    tpu.enqueue_dma source(%53 : memref<1x16xf32, #tpu.memory_space<any>>) target(%54 : memref<1x16xf32, #tpu.memory_space<vmem>>) target_semaphore(%56 : memref<!tpu.dma_semaphore, #tpu.memory_space<semaphore_mem>>)
    %c4_i32 = arith.constant 4 : i32
    %57 = arith.addi %0, %c4_i32 : i32
    %58 = arith.index_cast %57 : i32 to index
    %59 = memref.load %arg1[%58] : memref<8xi32, #tpu.memory_space<smem>>
    %c4_i32_44 = arith.constant 4 : i32
    %60 = arith.addi %0, %c4_i32_44 : i32
    %61 = arith.index_cast %60 : i32 to index
    %62 = memref.load %arg2[%61] : memref<8xi32, #tpu.memory_space<smem>>
    %c0_i32_45 = arith.constant 0 : i32
    %c4_i32_46 = arith.constant 4 : i32
    %c0_i32_47 = arith.constant 0 : i32
    %63 = tpu.memref_slice %arg4[%59, %c0_i32_47] : memref<32x16xf32, #tpu.memory_space<any>> -> memref<1x16xf32, #tpu.memory_space<any>>
    %c4_i32_48 = arith.constant 4 : i32
    %c0_i32_49 = arith.constant 0 : i32
    %64 = tpu.memref_slice %arg21[%c4_i32_48, %c0_i32_49] : memref<8x16xf32, #tpu.memory_space<vmem>> -> memref<1x16xf32, #tpu.memory_space<vmem>>
    %65 = tpu.memref_slice %arg23[%c0_i32_45, %c4_i32_46] : memref<2x8x!tpu.dma_semaphore, #tpu.memory_space<semaphore_mem>> -> memref<1x1x!tpu.dma_semaphore, #tpu.memory_space<semaphore_mem>>
    %66 = tpu.memref_squeeze %65 : memref<1x1x!tpu.dma_semaphore, #tpu.memory_space<semaphore_mem>> -> memref<!tpu.dma_semaphore, #tpu.memory_space<semaphore_mem>>
    tpu.enqueue_dma source(%63 : memref<1x16xf32, #tpu.memory_space<any>>) target(%64 : memref<1x16xf32, #tpu.memory_space<vmem>>) target_semaphore(%66 : memref<!tpu.dma_semaphore, #tpu.memory_space<semaphore_mem>>)
    %c1_i32_50 = arith.constant 1 : i32
    %c4_i32_51 = arith.constant 4 : i32
    %c0_i32_52 = arith.constant 0 : i32
    %67 = tpu.memref_slice %arg5[%62, %c0_i32_52] : memref<64x16xf32, #tpu.memory_space<any>> -> memref<1x16xf32, #tpu.memory_space<any>>
    %c4_i32_53 = arith.constant 4 : i32
    %c0_i32_54 = arith.constant 0 : i32
    %68 = tpu.memref_slice %arg22[%c4_i32_53, %c0_i32_54] : memref<8x16xf32, #tpu.memory_space<vmem>> -> memref<1x16xf32, #tpu.memory_space<vmem>>
    %69 = tpu.memref_slice %arg23[%c1_i32_50, %c4_i32_51] : memref<2x8x!tpu.dma_semaphore, #tpu.memory_space<semaphore_mem>> -> memref<1x1x!tpu.dma_semaphore, #tpu.memory_space<semaphore_mem>>
    %70 = tpu.memref_squeeze %69 : memref<1x1x!tpu.dma_semaphore, #tpu.memory_space<semaphore_mem>> -> memref<!tpu.dma_semaphore, #tpu.memory_space<semaphore_mem>>
    tpu.enqueue_dma source(%67 : memref<1x16xf32, #tpu.memory_space<any>>) target(%68 : memref<1x16xf32, #tpu.memory_space<vmem>>) target_semaphore(%70 : memref<!tpu.dma_semaphore, #tpu.memory_space<semaphore_mem>>)
    %c5_i32 = arith.constant 5 : i32
    %71 = arith.addi %0, %c5_i32 : i32
    %72 = arith.index_cast %71 : i32 to index
    %73 = memref.load %arg1[%72] : memref<8xi32, #tpu.memory_space<smem>>
    %c5_i32_55 = arith.constant 5 : i32
    %74 = arith.addi %0, %c5_i32_55 : i32
    %75 = arith.index_cast %74 : i32 to index
    %76 = memref.load %arg2[%75] : memref<8xi32, #tpu.memory_space<smem>>
    %c0_i32_56 = arith.constant 0 : i32
    %c5_i32_57 = arith.constant 5 : i32
    %c0_i32_58 = arith.constant 0 : i32
    %77 = tpu.memref_slice %arg4[%73, %c0_i32_58] : memref<32x16xf32, #tpu.memory_space<any>> -> memref<1x16xf32, #tpu.memory_space<any>>
    %c5_i32_59 = arith.constant 5 : i32
    %c0_i32_60 = arith.constant 0 : i32
    %78 = tpu.memref_slice %arg21[%c5_i32_59, %c0_i32_60] : memref<8x16xf32, #tpu.memory_space<vmem>> -> memref<1x16xf32, #tpu.memory_space<vmem>>
    %79 = tpu.memref_slice %arg23[%c0_i32_56, %c5_i32_57] : memref<2x8x!tpu.dma_semaphore, #tpu.memory_space<semaphore_mem>> -> memref<1x1x!tpu.dma_semaphore, #tpu.memory_space<semaphore_mem>>
    %80 = tpu.memref_squeeze %79 : memref<1x1x!tpu.dma_semaphore, #tpu.memory_space<semaphore_mem>> -> memref<!tpu.dma_semaphore, #tpu.memory_space<semaphore_mem>>
    tpu.enqueue_dma source(%77 : memref<1x16xf32, #tpu.memory_space<any>>) target(%78 : memref<1x16xf32, #tpu.memory_space<vmem>>) target_semaphore(%80 : memref<!tpu.dma_semaphore, #tpu.memory_space<semaphore_mem>>)
    %c1_i32_61 = arith.constant 1 : i32
    %c5_i32_62 = arith.constant 5 : i32
    %c0_i32_63 = arith.constant 0 : i32
    %81 = tpu.memref_slice %arg5[%76, %c0_i32_63] : memref<64x16xf32, #tpu.memory_space<any>> -> memref<1x16xf32, #tpu.memory_space<any>>
    %c5_i32_64 = arith.constant 5 : i32
    %c0_i32_65 = arith.constant 0 : i32
    %82 = tpu.memref_slice %arg22[%c5_i32_64, %c0_i32_65] : memref<8x16xf32, #tpu.memory_space<vmem>> -> memref<1x16xf32, #tpu.memory_space<vmem>>
    %83 = tpu.memref_slice %arg23[%c1_i32_61, %c5_i32_62] : memref<2x8x!tpu.dma_semaphore, #tpu.memory_space<semaphore_mem>> -> memref<1x1x!tpu.dma_semaphore, #tpu.memory_space<semaphore_mem>>
    %84 = tpu.memref_squeeze %83 : memref<1x1x!tpu.dma_semaphore, #tpu.memory_space<semaphore_mem>> -> memref<!tpu.dma_semaphore, #tpu.memory_space<semaphore_mem>>
    tpu.enqueue_dma source(%81 : memref<1x16xf32, #tpu.memory_space<any>>) target(%82 : memref<1x16xf32, #tpu.memory_space<vmem>>) target_semaphore(%84 : memref<!tpu.dma_semaphore, #tpu.memory_space<semaphore_mem>>)
    %c6_i32 = arith.constant 6 : i32
    %85 = arith.addi %0, %c6_i32 : i32
    %86 = arith.index_cast %85 : i32 to index
    %87 = memref.load %arg1[%86] : memref<8xi32, #tpu.memory_space<smem>>
    %c6_i32_66 = arith.constant 6 : i32
    %88 = arith.addi %0, %c6_i32_66 : i32
    %89 = arith.index_cast %88 : i32 to index
    %90 = memref.load %arg2[%89] : memref<8xi32, #tpu.memory_space<smem>>
    %c0_i32_67 = arith.constant 0 : i32
    %c6_i32_68 = arith.constant 6 : i32
    %c0_i32_69 = arith.constant 0 : i32
    %91 = tpu.memref_slice %arg4[%87, %c0_i32_69] : memref<32x16xf32, #tpu.memory_space<any>> -> memref<1x16xf32, #tpu.memory_space<any>>
    %c6_i32_70 = arith.constant 6 : i32
    %c0_i32_71 = arith.constant 0 : i32
    %92 = tpu.memref_slice %arg21[%c6_i32_70, %c0_i32_71] : memref<8x16xf32, #tpu.memory_space<vmem>> -> memref<1x16xf32, #tpu.memory_space<vmem>>
    %93 = tpu.memref_slice %arg23[%c0_i32_67, %c6_i32_68] : memref<2x8x!tpu.dma_semaphore, #tpu.memory_space<semaphore_mem>> -> memref<1x1x!tpu.dma_semaphore, #tpu.memory_space<semaphore_mem>>
    %94 = tpu.memref_squeeze %93 : memref<1x1x!tpu.dma_semaphore, #tpu.memory_space<semaphore_mem>> -> memref<!tpu.dma_semaphore, #tpu.memory_space<semaphore_mem>>
    tpu.enqueue_dma source(%91 : memref<1x16xf32, #tpu.memory_space<any>>) target(%92 : memref<1x16xf32, #tpu.memory_space<vmem>>) target_semaphore(%94 : memref<!tpu.dma_semaphore, #tpu.memory_space<semaphore_mem>>)
    %c1_i32_72 = arith.constant 1 : i32
    %c6_i32_73 = arith.constant 6 : i32
    %c0_i32_74 = arith.constant 0 : i32
    %95 = tpu.memref_slice %arg5[%90, %c0_i32_74] : memref<64x16xf32, #tpu.memory_space<any>> -> memref<1x16xf32, #tpu.memory_space<any>>
    %c6_i32_75 = arith.constant 6 : i32
    %c0_i32_76 = arith.constant 0 : i32
    %96 = tpu.memref_slice %arg22[%c6_i32_75, %c0_i32_76] : memref<8x16xf32, #tpu.memory_space<vmem>> -> memref<1x16xf32, #tpu.memory_space<vmem>>
    %97 = tpu.memref_slice %arg23[%c1_i32_72, %c6_i32_73] : memref<2x8x!tpu.dma_semaphore, #tpu.memory_space<semaphore_mem>> -> memref<1x1x!tpu.dma_semaphore, #tpu.memory_space<semaphore_mem>>
    %98 = tpu.memref_squeeze %97 : memref<1x1x!tpu.dma_semaphore, #tpu.memory_space<semaphore_mem>> -> memref<!tpu.dma_semaphore, #tpu.memory_space<semaphore_mem>>
    tpu.enqueue_dma source(%95 : memref<1x16xf32, #tpu.memory_space<any>>) target(%96 : memref<1x16xf32, #tpu.memory_space<vmem>>) target_semaphore(%98 : memref<!tpu.dma_semaphore, #tpu.memory_space<semaphore_mem>>)
    %c7_i32 = arith.constant 7 : i32
    %99 = arith.addi %0, %c7_i32 : i32
    %100 = arith.index_cast %99 : i32 to index
    %101 = memref.load %arg1[%100] : memref<8xi32, #tpu.memory_space<smem>>
    %c7_i32_77 = arith.constant 7 : i32
    %102 = arith.addi %0, %c7_i32_77 : i32
    %103 = arith.index_cast %102 : i32 to index
    %104 = memref.load %arg2[%103] : memref<8xi32, #tpu.memory_space<smem>>
    %c0_i32_78 = arith.constant 0 : i32
    %c7_i32_79 = arith.constant 7 : i32
    %c0_i32_80 = arith.constant 0 : i32
    %105 = tpu.memref_slice %arg4[%101, %c0_i32_80] : memref<32x16xf32, #tpu.memory_space<any>> -> memref<1x16xf32, #tpu.memory_space<any>>
    %c7_i32_81 = arith.constant 7 : i32
    %c0_i32_82 = arith.constant 0 : i32
    %106 = tpu.memref_slice %arg21[%c7_i32_81, %c0_i32_82] : memref<8x16xf32, #tpu.memory_space<vmem>> -> memref<1x16xf32, #tpu.memory_space<vmem>>
    %107 = tpu.memref_slice %arg23[%c0_i32_78, %c7_i32_79] : memref<2x8x!tpu.dma_semaphore, #tpu.memory_space<semaphore_mem>> -> memref<1x1x!tpu.dma_semaphore, #tpu.memory_space<semaphore_mem>>
    %108 = tpu.memref_squeeze %107 : memref<1x1x!tpu.dma_semaphore, #tpu.memory_space<semaphore_mem>> -> memref<!tpu.dma_semaphore, #tpu.memory_space<semaphore_mem>>
    tpu.enqueue_dma source(%105 : memref<1x16xf32, #tpu.memory_space<any>>) target(%106 : memref<1x16xf32, #tpu.memory_space<vmem>>) target_semaphore(%108 : memref<!tpu.dma_semaphore, #tpu.memory_space<semaphore_mem>>)
    %c1_i32_83 = arith.constant 1 : i32
    %c7_i32_84 = arith.constant 7 : i32
    %c0_i32_85 = arith.constant 0 : i32
    %109 = tpu.memref_slice %arg5[%104, %c0_i32_85] : memref<64x16xf32, #tpu.memory_space<any>> -> memref<1x16xf32, #tpu.memory_space<any>>
    %c7_i32_86 = arith.constant 7 : i32
    %c0_i32_87 = arith.constant 0 : i32
    %110 = tpu.memref_slice %arg22[%c7_i32_86, %c0_i32_87] : memref<8x16xf32, #tpu.memory_space<vmem>> -> memref<1x16xf32, #tpu.memory_space<vmem>>
    %111 = tpu.memref_slice %arg23[%c1_i32_83, %c7_i32_84] : memref<2x8x!tpu.dma_semaphore, #tpu.memory_space<semaphore_mem>> -> memref<1x1x!tpu.dma_semaphore, #tpu.memory_space<semaphore_mem>>
    %112 = tpu.memref_squeeze %111 : memref<1x1x!tpu.dma_semaphore, #tpu.memory_space<semaphore_mem>> -> memref<!tpu.dma_semaphore, #tpu.memory_space<semaphore_mem>>
    tpu.enqueue_dma source(%109 : memref<1x16xf32, #tpu.memory_space<any>>) target(%110 : memref<1x16xf32, #tpu.memory_space<vmem>>) target_semaphore(%112 : memref<!tpu.dma_semaphore, #tpu.memory_space<semaphore_mem>>)
    %c0_i32_88 = arith.constant 0 : i32
    %c0_i32_89 = arith.constant 0 : i32
    %c0_i32_90 = arith.constant 0 : i32
    %113 = tpu.memref_slice %arg4[%3, %c0_i32_90] : memref<32x16xf32, #tpu.memory_space<any>> -> memref<1x16xf32, #tpu.memory_space<any>>
    %c0_i32_91 = arith.constant 0 : i32
    %c0_i32_92 = arith.constant 0 : i32
    %114 = tpu.memref_slice %arg21[%c0_i32_91, %c0_i32_92] : memref<8x16xf32, #tpu.memory_space<vmem>> -> memref<1x16xf32, #tpu.memory_space<vmem>>
    %115 = tpu.memref_slice %arg23[%c0_i32_88, %c0_i32_89] : memref<2x8x!tpu.dma_semaphore, #tpu.memory_space<semaphore_mem>> -> memref<1x1x!tpu.dma_semaphore, #tpu.memory_space<semaphore_mem>>
    %116 = tpu.memref_squeeze %115 : memref<1x1x!tpu.dma_semaphore, #tpu.memory_space<semaphore_mem>> -> memref<!tpu.dma_semaphore, #tpu.memory_space<semaphore_mem>>
    tpu.wait_dma2 semaphore(%116 : memref<!tpu.dma_semaphore, #tpu.memory_space<semaphore_mem>>) src(%113 : memref<1x16xf32, #tpu.memory_space<any>>) dst(%114 : memref<1x16xf32, #tpu.memory_space<vmem>>)
    %c1_i32_93 = arith.constant 1 : i32
    %c0_i32_94 = arith.constant 0 : i32
    %c0_i32_95 = arith.constant 0 : i32
    %117 = tpu.memref_slice %arg5[%6, %c0_i32_95] : memref<64x16xf32, #tpu.memory_space<any>> -> memref<1x16xf32, #tpu.memory_space<any>>
    %c0_i32_96 = arith.constant 0 : i32
    %c0_i32_97 = arith.constant 0 : i32
    %118 = tpu.memref_slice %arg22[%c0_i32_96, %c0_i32_97] : memref<8x16xf32, #tpu.memory_space<vmem>> -> memref<1x16xf32, #tpu.memory_space<vmem>>
    %119 = tpu.memref_slice %arg23[%c1_i32_93, %c0_i32_94] : memref<2x8x!tpu.dma_semaphore, #tpu.memory_space<semaphore_mem>> -> memref<1x1x!tpu.dma_semaphore, #tpu.memory_space<semaphore_mem>>
    %120 = tpu.memref_squeeze %119 : memref<1x1x!tpu.dma_semaphore, #tpu.memory_space<semaphore_mem>> -> memref<!tpu.dma_semaphore, #tpu.memory_space<semaphore_mem>>
    tpu.wait_dma2 semaphore(%120 : memref<!tpu.dma_semaphore, #tpu.memory_space<semaphore_mem>>) src(%117 : memref<1x16xf32, #tpu.memory_space<any>>) dst(%118 : memref<1x16xf32, #tpu.memory_space<vmem>>)
    %c0_i32_98 = arith.constant 0 : i32
    %c1_i32_99 = arith.constant 1 : i32
    %c0_i32_100 = arith.constant 0 : i32
    %121 = tpu.memref_slice %arg4[%17, %c0_i32_100] : memref<32x16xf32, #tpu.memory_space<any>> -> memref<1x16xf32, #tpu.memory_space<any>>
    %c1_i32_101 = arith.constant 1 : i32
    %c0_i32_102 = arith.constant 0 : i32
    %122 = tpu.memref_slice %arg21[%c1_i32_101, %c0_i32_102] : memref<8x16xf32, #tpu.memory_space<vmem>> -> memref<1x16xf32, #tpu.memory_space<vmem>>
    %123 = tpu.memref_slice %arg23[%c0_i32_98, %c1_i32_99] : memref<2x8x!tpu.dma_semaphore, #tpu.memory_space<semaphore_mem>> -> memref<1x1x!tpu.dma_semaphore, #tpu.memory_space<semaphore_mem>>
    %124 = tpu.memref_squeeze %123 : memref<1x1x!tpu.dma_semaphore, #tpu.memory_space<semaphore_mem>> -> memref<!tpu.dma_semaphore, #tpu.memory_space<semaphore_mem>>
    tpu.wait_dma2 semaphore(%124 : memref<!tpu.dma_semaphore, #tpu.memory_space<semaphore_mem>>) src(%121 : memref<1x16xf32, #tpu.memory_space<any>>) dst(%122 : memref<1x16xf32, #tpu.memory_space<vmem>>)
    %c1_i32_103 = arith.constant 1 : i32
    %c1_i32_104 = arith.constant 1 : i32
    %c0_i32_105 = arith.constant 0 : i32
    %125 = tpu.memref_slice %arg5[%20, %c0_i32_105] : memref<64x16xf32, #tpu.memory_space<any>> -> memref<1x16xf32, #tpu.memory_space<any>>
    %c1_i32_106 = arith.constant 1 : i32
    %c0_i32_107 = arith.constant 0 : i32
    %126 = tpu.memref_slice %arg22[%c1_i32_106, %c0_i32_107] : memref<8x16xf32, #tpu.memory_space<vmem>> -> memref<1x16xf32, #tpu.memory_space<vmem>>
    %127 = tpu.memref_slice %arg23[%c1_i32_103, %c1_i32_104] : memref<2x8x!tpu.dma_semaphore, #tpu.memory_space<semaphore_mem>> -> memref<1x1x!tpu.dma_semaphore, #tpu.memory_space<semaphore_mem>>
    %128 = tpu.memref_squeeze %127 : memref<1x1x!tpu.dma_semaphore, #tpu.memory_space<semaphore_mem>> -> memref<!tpu.dma_semaphore, #tpu.memory_space<semaphore_mem>>
    tpu.wait_dma2 semaphore(%128 : memref<!tpu.dma_semaphore, #tpu.memory_space<semaphore_mem>>) src(%125 : memref<1x16xf32, #tpu.memory_space<any>>) dst(%126 : memref<1x16xf32, #tpu.memory_space<vmem>>)
    %c0_i32_108 = arith.constant 0 : i32
    %c2_i32_109 = arith.constant 2 : i32
    %c0_i32_110 = arith.constant 0 : i32
    %129 = tpu.memref_slice %arg4[%31, %c0_i32_110] : memref<32x16xf32, #tpu.memory_space<any>> -> memref<1x16xf32, #tpu.memory_space<any>>
    %c2_i32_111 = arith.constant 2 : i32
    %c0_i32_112 = arith.constant 0 : i32
    %130 = tpu.memref_slice %arg21[%c2_i32_111, %c0_i32_112] : memref<8x16xf32, #tpu.memory_space<vmem>> -> memref<1x16xf32, #tpu.memory_space<vmem>>
    %131 = tpu.memref_slice %arg23[%c0_i32_108, %c2_i32_109] : memref<2x8x!tpu.dma_semaphore, #tpu.memory_space<semaphore_mem>> -> memref<1x1x!tpu.dma_semaphore, #tpu.memory_space<semaphore_mem>>
    %132 = tpu.memref_squeeze %131 : memref<1x1x!tpu.dma_semaphore, #tpu.memory_space<semaphore_mem>> -> memref<!tpu.dma_semaphore, #tpu.memory_space<semaphore_mem>>
    tpu.wait_dma2 semaphore(%132 : memref<!tpu.dma_semaphore, #tpu.memory_space<semaphore_mem>>) src(%129 : memref<1x16xf32, #tpu.memory_space<any>>) dst(%130 : memref<1x16xf32, #tpu.memory_space<vmem>>)
    %c1_i32_113 = arith.constant 1 : i32
    %c2_i32_114 = arith.constant 2 : i32
    %c0_i32_115 = arith.constant 0 : i32
    %133 = tpu.memref_slice %arg5[%34, %c0_i32_115] : memref<64x16xf32, #tpu.memory_space<any>> -> memref<1x16xf32, #tpu.memory_space<any>>
    %c2_i32_116 = arith.constant 2 : i32
    %c0_i32_117 = arith.constant 0 : i32
    %134 = tpu.memref_slice %arg22[%c2_i32_116, %c0_i32_117] : memref<8x16xf32, #tpu.memory_space<vmem>> -> memref<1x16xf32, #tpu.memory_space<vmem>>
    %135 = tpu.memref_slice %arg23[%c1_i32_113, %c2_i32_114] : memref<2x8x!tpu.dma_semaphore, #tpu.memory_space<semaphore_mem>> -> memref<1x1x!tpu.dma_semaphore, #tpu.memory_space<semaphore_mem>>
    %136 = tpu.memref_squeeze %135 : memref<1x1x!tpu.dma_semaphore, #tpu.memory_space<semaphore_mem>> -> memref<!tpu.dma_semaphore, #tpu.memory_space<semaphore_mem>>
    tpu.wait_dma2 semaphore(%136 : memref<!tpu.dma_semaphore, #tpu.memory_space<semaphore_mem>>) src(%133 : memref<1x16xf32, #tpu.memory_space<any>>) dst(%134 : memref<1x16xf32, #tpu.memory_space<vmem>>)
    %c0_i32_118 = arith.constant 0 : i32
    %c3_i32_119 = arith.constant 3 : i32
    %c0_i32_120 = arith.constant 0 : i32
    %137 = tpu.memref_slice %arg4[%45, %c0_i32_120] : memref<32x16xf32, #tpu.memory_space<any>> -> memref<1x16xf32, #tpu.memory_space<any>>
    %c3_i32_121 = arith.constant 3 : i32
    %c0_i32_122 = arith.constant 0 : i32
    %138 = tpu.memref_slice %arg21[%c3_i32_121, %c0_i32_122] : memref<8x16xf32, #tpu.memory_space<vmem>> -> memref<1x16xf32, #tpu.memory_space<vmem>>
    %139 = tpu.memref_slice %arg23[%c0_i32_118, %c3_i32_119] : memref<2x8x!tpu.dma_semaphore, #tpu.memory_space<semaphore_mem>> -> memref<1x1x!tpu.dma_semaphore, #tpu.memory_space<semaphore_mem>>
    %140 = tpu.memref_squeeze %139 : memref<1x1x!tpu.dma_semaphore, #tpu.memory_space<semaphore_mem>> -> memref<!tpu.dma_semaphore, #tpu.memory_space<semaphore_mem>>
    tpu.wait_dma2 semaphore(%140 : memref<!tpu.dma_semaphore, #tpu.memory_space<semaphore_mem>>) src(%137 : memref<1x16xf32, #tpu.memory_space<any>>) dst(%138 : memref<1x16xf32, #tpu.memory_space<vmem>>)
    %c1_i32_123 = arith.constant 1 : i32
    %c3_i32_124 = arith.constant 3 : i32
    %c0_i32_125 = arith.constant 0 : i32
    %141 = tpu.memref_slice %arg5[%48, %c0_i32_125] : memref<64x16xf32, #tpu.memory_space<any>> -> memref<1x16xf32, #tpu.memory_space<any>>
    %c3_i32_126 = arith.constant 3 : i32
    %c0_i32_127 = arith.constant 0 : i32
    %142 = tpu.memref_slice %arg22[%c3_i32_126, %c0_i32_127] : memref<8x16xf32, #tpu.memory_space<vmem>> -> memref<1x16xf32, #tpu.memory_space<vmem>>
    %143 = tpu.memref_slice %arg23[%c1_i32_123, %c3_i32_124] : memref<2x8x!tpu.dma_semaphore, #tpu.memory_space<semaphore_mem>> -> memref<1x1x!tpu.dma_semaphore, #tpu.memory_space<semaphore_mem>>
    %144 = tpu.memref_squeeze %143 : memref<1x1x!tpu.dma_semaphore, #tpu.memory_space<semaphore_mem>> -> memref<!tpu.dma_semaphore, #tpu.memory_space<semaphore_mem>>
    tpu.wait_dma2 semaphore(%144 : memref<!tpu.dma_semaphore, #tpu.memory_space<semaphore_mem>>) src(%141 : memref<1x16xf32, #tpu.memory_space<any>>) dst(%142 : memref<1x16xf32, #tpu.memory_space<vmem>>)
    %c0_i32_128 = arith.constant 0 : i32
    %c4_i32_129 = arith.constant 4 : i32
    %c0_i32_130 = arith.constant 0 : i32
    %145 = tpu.memref_slice %arg4[%59, %c0_i32_130] : memref<32x16xf32, #tpu.memory_space<any>> -> memref<1x16xf32, #tpu.memory_space<any>>
    %c4_i32_131 = arith.constant 4 : i32
    %c0_i32_132 = arith.constant 0 : i32
    %146 = tpu.memref_slice %arg21[%c4_i32_131, %c0_i32_132] : memref<8x16xf32, #tpu.memory_space<vmem>> -> memref<1x16xf32, #tpu.memory_space<vmem>>
    %147 = tpu.memref_slice %arg23[%c0_i32_128, %c4_i32_129] : memref<2x8x!tpu.dma_semaphore, #tpu.memory_space<semaphore_mem>> -> memref<1x1x!tpu.dma_semaphore, #tpu.memory_space<semaphore_mem>>
    %148 = tpu.memref_squeeze %147 : memref<1x1x!tpu.dma_semaphore, #tpu.memory_space<semaphore_mem>> -> memref<!tpu.dma_semaphore, #tpu.memory_space<semaphore_mem>>
    tpu.wait_dma2 semaphore(%148 : memref<!tpu.dma_semaphore, #tpu.memory_space<semaphore_mem>>) src(%145 : memref<1x16xf32, #tpu.memory_space<any>>) dst(%146 : memref<1x16xf32, #tpu.memory_space<vmem>>)
    %c1_i32_133 = arith.constant 1 : i32
    %c4_i32_134 = arith.constant 4 : i32
    %c0_i32_135 = arith.constant 0 : i32
    %149 = tpu.memref_slice %arg5[%62, %c0_i32_135] : memref<64x16xf32, #tpu.memory_space<any>> -> memref<1x16xf32, #tpu.memory_space<any>>
    %c4_i32_136 = arith.constant 4 : i32
    %c0_i32_137 = arith.constant 0 : i32
    %150 = tpu.memref_slice %arg22[%c4_i32_136, %c0_i32_137] : memref<8x16xf32, #tpu.memory_space<vmem>> -> memref<1x16xf32, #tpu.memory_space<vmem>>
    %151 = tpu.memref_slice %arg23[%c1_i32_133, %c4_i32_134] : memref<2x8x!tpu.dma_semaphore, #tpu.memory_space<semaphore_mem>> -> memref<1x1x!tpu.dma_semaphore, #tpu.memory_space<semaphore_mem>>
    %152 = tpu.memref_squeeze %151 : memref<1x1x!tpu.dma_semaphore, #tpu.memory_space<semaphore_mem>> -> memref<!tpu.dma_semaphore, #tpu.memory_space<semaphore_mem>>
    tpu.wait_dma2 semaphore(%152 : memref<!tpu.dma_semaphore, #tpu.memory_space<semaphore_mem>>) src(%149 : memref<1x16xf32, #tpu.memory_space<any>>) dst(%150 : memref<1x16xf32, #tpu.memory_space<vmem>>)
    %c0_i32_138 = arith.constant 0 : i32
    %c5_i32_139 = arith.constant 5 : i32
    %c0_i32_140 = arith.constant 0 : i32
    %153 = tpu.memref_slice %arg4[%73, %c0_i32_140] : memref<32x16xf32, #tpu.memory_space<any>> -> memref<1x16xf32, #tpu.memory_space<any>>
    %c5_i32_141 = arith.constant 5 : i32
    %c0_i32_142 = arith.constant 0 : i32
    %154 = tpu.memref_slice %arg21[%c5_i32_141, %c0_i32_142] : memref<8x16xf32, #tpu.memory_space<vmem>> -> memref<1x16xf32, #tpu.memory_space<vmem>>
    %155 = tpu.memref_slice %arg23[%c0_i32_138, %c5_i32_139] : memref<2x8x!tpu.dma_semaphore, #tpu.memory_space<semaphore_mem>> -> memref<1x1x!tpu.dma_semaphore, #tpu.memory_space<semaphore_mem>>
    %156 = tpu.memref_squeeze %155 : memref<1x1x!tpu.dma_semaphore, #tpu.memory_space<semaphore_mem>> -> memref<!tpu.dma_semaphore, #tpu.memory_space<semaphore_mem>>
    tpu.wait_dma2 semaphore(%156 : memref<!tpu.dma_semaphore, #tpu.memory_space<semaphore_mem>>) src(%153 : memref<1x16xf32, #tpu.memory_space<any>>) dst(%154 : memref<1x16xf32, #tpu.memory_space<vmem>>)
    %c1_i32_143 = arith.constant 1 : i32
    %c5_i32_144 = arith.constant 5 : i32
    %c0_i32_145 = arith.constant 0 : i32
    %157 = tpu.memref_slice %arg5[%76, %c0_i32_145] : memref<64x16xf32, #tpu.memory_space<any>> -> memref<1x16xf32, #tpu.memory_space<any>>
    %c5_i32_146 = arith.constant 5 : i32
    %c0_i32_147 = arith.constant 0 : i32
    %158 = tpu.memref_slice %arg22[%c5_i32_146, %c0_i32_147] : memref<8x16xf32, #tpu.memory_space<vmem>> -> memref<1x16xf32, #tpu.memory_space<vmem>>
    %159 = tpu.memref_slice %arg23[%c1_i32_143, %c5_i32_144] : memref<2x8x!tpu.dma_semaphore, #tpu.memory_space<semaphore_mem>> -> memref<1x1x!tpu.dma_semaphore, #tpu.memory_space<semaphore_mem>>
    %160 = tpu.memref_squeeze %159 : memref<1x1x!tpu.dma_semaphore, #tpu.memory_space<semaphore_mem>> -> memref<!tpu.dma_semaphore, #tpu.memory_space<semaphore_mem>>
    tpu.wait_dma2 semaphore(%160 : memref<!tpu.dma_semaphore, #tpu.memory_space<semaphore_mem>>) src(%157 : memref<1x16xf32, #tpu.memory_space<any>>) dst(%158 : memref<1x16xf32, #tpu.memory_space<vmem>>)
    %c0_i32_148 = arith.constant 0 : i32
    %c6_i32_149 = arith.constant 6 : i32
    %c0_i32_150 = arith.constant 0 : i32
    %161 = tpu.memref_slice %arg4[%87, %c0_i32_150] : memref<32x16xf32, #tpu.memory_space<any>> -> memref<1x16xf32, #tpu.memory_space<any>>
    %c6_i32_151 = arith.constant 6 : i32
    %c0_i32_152 = arith.constant 0 : i32
    %162 = tpu.memref_slice %arg21[%c6_i32_151, %c0_i32_152] : memref<8x16xf32, #tpu.memory_space<vmem>> -> memref<1x16xf32, #tpu.memory_space<vmem>>
    %163 = tpu.memref_slice %arg23[%c0_i32_148, %c6_i32_149] : memref<2x8x!tpu.dma_semaphore, #tpu.memory_space<semaphore_mem>> -> memref<1x1x!tpu.dma_semaphore, #tpu.memory_space<semaphore_mem>>
    %164 = tpu.memref_squeeze %163 : memref<1x1x!tpu.dma_semaphore, #tpu.memory_space<semaphore_mem>> -> memref<!tpu.dma_semaphore, #tpu.memory_space<semaphore_mem>>
    tpu.wait_dma2 semaphore(%164 : memref<!tpu.dma_semaphore, #tpu.memory_space<semaphore_mem>>) src(%161 : memref<1x16xf32, #tpu.memory_space<any>>) dst(%162 : memref<1x16xf32, #tpu.memory_space<vmem>>)
    %c1_i32_153 = arith.constant 1 : i32
    %c6_i32_154 = arith.constant 6 : i32
    %c0_i32_155 = arith.constant 0 : i32
    %165 = tpu.memref_slice %arg5[%90, %c0_i32_155] : memref<64x16xf32, #tpu.memory_space<any>> -> memref<1x16xf32, #tpu.memory_space<any>>
    %c6_i32_156 = arith.constant 6 : i32
    %c0_i32_157 = arith.constant 0 : i32
    %166 = tpu.memref_slice %arg22[%c6_i32_156, %c0_i32_157] : memref<8x16xf32, #tpu.memory_space<vmem>> -> memref<1x16xf32, #tpu.memory_space<vmem>>
    %167 = tpu.memref_slice %arg23[%c1_i32_153, %c6_i32_154] : memref<2x8x!tpu.dma_semaphore, #tpu.memory_space<semaphore_mem>> -> memref<1x1x!tpu.dma_semaphore, #tpu.memory_space<semaphore_mem>>
    %168 = tpu.memref_squeeze %167 : memref<1x1x!tpu.dma_semaphore, #tpu.memory_space<semaphore_mem>> -> memref<!tpu.dma_semaphore, #tpu.memory_space<semaphore_mem>>
    tpu.wait_dma2 semaphore(%168 : memref<!tpu.dma_semaphore, #tpu.memory_space<semaphore_mem>>) src(%165 : memref<1x16xf32, #tpu.memory_space<any>>) dst(%166 : memref<1x16xf32, #tpu.memory_space<vmem>>)
    %c0_i32_158 = arith.constant 0 : i32
    %c7_i32_159 = arith.constant 7 : i32
    %c0_i32_160 = arith.constant 0 : i32
    %169 = tpu.memref_slice %arg4[%101, %c0_i32_160] : memref<32x16xf32, #tpu.memory_space<any>> -> memref<1x16xf32, #tpu.memory_space<any>>
    %c7_i32_161 = arith.constant 7 : i32
    %c0_i32_162 = arith.constant 0 : i32
    %170 = tpu.memref_slice %arg21[%c7_i32_161, %c0_i32_162] : memref<8x16xf32, #tpu.memory_space<vmem>> -> memref<1x16xf32, #tpu.memory_space<vmem>>
    %171 = tpu.memref_slice %arg23[%c0_i32_158, %c7_i32_159] : memref<2x8x!tpu.dma_semaphore, #tpu.memory_space<semaphore_mem>> -> memref<1x1x!tpu.dma_semaphore, #tpu.memory_space<semaphore_mem>>
    %172 = tpu.memref_squeeze %171 : memref<1x1x!tpu.dma_semaphore, #tpu.memory_space<semaphore_mem>> -> memref<!tpu.dma_semaphore, #tpu.memory_space<semaphore_mem>>
    tpu.wait_dma2 semaphore(%172 : memref<!tpu.dma_semaphore, #tpu.memory_space<semaphore_mem>>) src(%169 : memref<1x16xf32, #tpu.memory_space<any>>) dst(%170 : memref<1x16xf32, #tpu.memory_space<vmem>>)
    %c1_i32_163 = arith.constant 1 : i32
    %c7_i32_164 = arith.constant 7 : i32
    %c0_i32_165 = arith.constant 0 : i32
    %173 = tpu.memref_slice %arg5[%104, %c0_i32_165] : memref<64x16xf32, #tpu.memory_space<any>> -> memref<1x16xf32, #tpu.memory_space<any>>
    %c7_i32_166 = arith.constant 7 : i32
    %c0_i32_167 = arith.constant 0 : i32
    %174 = tpu.memref_slice %arg22[%c7_i32_166, %c0_i32_167] : memref<8x16xf32, #tpu.memory_space<vmem>> -> memref<1x16xf32, #tpu.memory_space<vmem>>
    %175 = tpu.memref_slice %arg23[%c1_i32_163, %c7_i32_164] : memref<2x8x!tpu.dma_semaphore, #tpu.memory_space<semaphore_mem>> -> memref<1x1x!tpu.dma_semaphore, #tpu.memory_space<semaphore_mem>>
    %176 = tpu.memref_squeeze %175 : memref<1x1x!tpu.dma_semaphore, #tpu.memory_space<semaphore_mem>> -> memref<!tpu.dma_semaphore, #tpu.memory_space<semaphore_mem>>
    tpu.wait_dma2 semaphore(%176 : memref<!tpu.dma_semaphore, #tpu.memory_space<semaphore_mem>>) src(%173 : memref<1x16xf32, #tpu.memory_space<any>>) dst(%174 : memref<1x16xf32, #tpu.memory_space<vmem>>)
    %c0 = arith.constant 0 : index
    %c0_168 = arith.constant 0 : index
    %177 = vector.load %arg21[%c0, %c0_168] : memref<8x16xf32, #tpu.memory_space<vmem>>, vector<8x16xf32>
    %c0_169 = arith.constant 0 : index
    %c0_170 = arith.constant 0 : index
    %178 = vector.load %arg22[%c0_169, %c0_170] : memref<8x16xf32, #tpu.memory_space<vmem>>, vector<8x16xf32>
    %c0_171 = arith.constant 0 : index
    %c0_172 = arith.constant 0 : index
    %179 = vector.load %arg3[%c0_171, %c0_172] : memref<8x4xf32, #tpu.memory_space<vmem>>, vector<8x4xf32>
    %c0_173 = arith.constant 0 : index
    %c0_174 = arith.constant 0 : index
    %180 = vector.load %arg6[%c0_173, %c0_174] : memref<36x96xf32, #tpu.memory_space<vmem>>, vector<16x96xf32>
    %cst = arith.constant dense<0.000000e+00> : vector<8x96xf32>
    %181 = tpu.matmul %177, %180, %cst {dimension_numbers = #tpu.dot_dimension_numbers<[1], [0], [0], [1], [0, 0, 1, 1], [], []>} : vector<8x16xf32>, vector<16x96xf32>, vector<8x96xf32> -> vector<8x96xf32>
    %c16 = arith.constant 16 : index
    %c0_175 = arith.constant 0 : index
    %182 = vector.load %arg6[%c16, %c0_175] : memref<36x96xf32, #tpu.memory_space<vmem>>, vector<16x96xf32>
    %cst_176 = arith.constant dense<0.000000e+00> : vector<8x96xf32>
    %183 = tpu.matmul %178, %182, %cst_176 {dimension_numbers = #tpu.dot_dimension_numbers<[1], [0], [0], [1], [0, 0, 1, 1], [], []>} : vector<8x16xf32>, vector<16x96xf32>, vector<8x96xf32> -> vector<8x96xf32>
    %184 = arith.addf %181, %183 : vector<8x96xf32>
    %c32 = arith.constant 32 : index
    %c0_177 = arith.constant 0 : index
    %185 = vector.load %arg6[%c32, %c0_177] : memref<36x96xf32, #tpu.memory_space<vmem>>, vector<4x96xf32>
    %cst_178 = arith.constant dense<0.000000e+00> : vector<8x96xf32>
    %186 = tpu.matmul %179, %185, %cst_178 {dimension_numbers = #tpu.dot_dimension_numbers<[1], [0], [0], [1], [0, 0, 1, 1], [], []>} : vector<8x4xf32>, vector<4x96xf32>, vector<8x96xf32> -> vector<8x96xf32>
    %187 = arith.addf %184, %186 : vector<8x96xf32>
    %c0_179 = arith.constant 0 : index
    %c0_180 = arith.constant 0 : index
    %188 = vector.load %arg7[%c0_179, %c0_180] : memref<1x96xf32, #tpu.memory_space<vmem>>, vector<1x96xf32>
    %189 = vector.broadcast %188 : vector<1x96xf32> to vector<8x96xf32>
    %190 = arith.addf %187, %189 : vector<8x96xf32>
    %cst_181 = arith.constant 0.000000e+00 : f32
    %191 = vector.broadcast %cst_181 : f32 to vector<8x96xf32>
    %192 = arith.maximumf %190, %191 : vector<8x96xf32>
    %c0_182 = arith.constant 0 : index
    %c0_183 = arith.constant 0 : index
    %193 = vector.load %arg8[%c0_182, %c0_183] : memref<96x48xf32, #tpu.memory_space<vmem>>, vector<96x48xf32>
    %cst_184 = arith.constant dense<0.000000e+00> : vector<8x48xf32>
    %194 = tpu.matmul %192, %193, %cst_184 {dimension_numbers = #tpu.dot_dimension_numbers<[1], [0], [0], [1], [0, 0, 1, 1], [], []>} : vector<8x96xf32>, vector<96x48xf32>, vector<8x48xf32> -> vector<8x48xf32>
    %c0_185 = arith.constant 0 : index
    %c0_186 = arith.constant 0 : index
    %195 = vector.load %arg9[%c0_185, %c0_186] : memref<1x48xf32, #tpu.memory_space<vmem>>, vector<1x48xf32>
    %196 = vector.broadcast %195 : vector<1x48xf32> to vector<8x48xf32>
    %197 = arith.addf %194, %196 : vector<8x48xf32>
    %cst_187 = arith.constant 0.000000e+00 : f32
    %198 = vector.broadcast %cst_187 : f32 to vector<8x48xf32>
    %199 = arith.maximumf %197, %198 : vector<8x48xf32>
    %c0_188 = arith.constant 0 : index
    %c0_189 = arith.constant 0 : index
    %200 = vector.load %arg10[%c0_188, %c0_189] : memref<36x6xf32, #tpu.memory_space<vmem>>, vector<16x6xf32>
    %cst_190 = arith.constant dense<0.000000e+00> : vector<8x6xf32>
    %201 = tpu.matmul %177, %200, %cst_190 {dimension_numbers = #tpu.dot_dimension_numbers<[1], [0], [0], [1], [0, 0, 1, 1], [], []>} : vector<8x16xf32>, vector<16x6xf32>, vector<8x6xf32> -> vector<8x6xf32>
    %c16_191 = arith.constant 16 : index
    %c0_192 = arith.constant 0 : index
    %202 = vector.load %arg10[%c16_191, %c0_192] : memref<36x6xf32, #tpu.memory_space<vmem>>, vector<16x6xf32>
    %cst_193 = arith.constant dense<0.000000e+00> : vector<8x6xf32>
    %203 = tpu.matmul %178, %202, %cst_193 {dimension_numbers = #tpu.dot_dimension_numbers<[1], [0], [0], [1], [0, 0, 1, 1], [], []>} : vector<8x16xf32>, vector<16x6xf32>, vector<8x6xf32> -> vector<8x6xf32>
    %204 = arith.addf %201, %203 : vector<8x6xf32>
    %c32_194 = arith.constant 32 : index
    %c0_195 = arith.constant 0 : index
    %205 = vector.load %arg10[%c32_194, %c0_195] : memref<36x6xf32, #tpu.memory_space<vmem>>, vector<4x6xf32>
    %cst_196 = arith.constant dense<0.000000e+00> : vector<8x6xf32>
    %206 = tpu.matmul %179, %205, %cst_196 {dimension_numbers = #tpu.dot_dimension_numbers<[1], [0], [0], [1], [0, 0, 1, 1], [], []>} : vector<8x4xf32>, vector<4x6xf32>, vector<8x6xf32> -> vector<8x6xf32>
    %207 = arith.addf %204, %206 : vector<8x6xf32>
    %c0_197 = arith.constant 0 : index
    %c0_198 = arith.constant 0 : index
    %208 = vector.load %arg11[%c0_197, %c0_198] : memref<1x6xf32, #tpu.memory_space<vmem>>, vector<1x6xf32>
    %209 = vector.broadcast %208 : vector<1x6xf32> to vector<8x6xf32>
    %210 = arith.addf %207, %209 : vector<8x6xf32>
    %211 = vector.extract_strided_slice %210 {offsets = [0, 0], sizes = [8, 3], strides = [1, 1]} : vector<8x6xf32> to vector<8x3xf32>
    %cst_199 = arith.constant dense<0xFF800000> : vector<8xf32>
    %212 = vector.multi_reduction <maximumf>, %211, %cst_199 [1] : vector<8x3xf32> to vector<8xf32>
    %213 = vector.shape_cast %212 : vector<8xf32> to vector<8x1xf32>
    %214 = vector.broadcast %213 : vector<8x1xf32> to vector<8x3xf32>
    %215 = arith.subf %211, %214 : vector<8x3xf32>
    %216 = math.exp %215 : vector<8x3xf32>
    %cst_200 = arith.constant dense<0.000000e+00> : vector<8xf32>
    %217 = vector.multi_reduction <add>, %216, %cst_200 [1] : vector<8x3xf32> to vector<8xf32>
    %218 = vector.shape_cast %217 : vector<8xf32> to vector<8x1xf32>
    %219 = vector.broadcast %218 : vector<8x1xf32> to vector<8x3xf32>
    %220 = arith.divf %216, %219 : vector<8x3xf32>
    %c0_201 = arith.constant 0 : index
    %c0_202 = arith.constant 0 : index
    %221 = vector.load %arg12[%c0_201, %c0_202] : memref<3x48xf32, #tpu.memory_space<vmem>>, vector<3x48xf32>
    %cst_203 = arith.constant dense<0.000000e+00> : vector<8x48xf32>
    %222 = tpu.matmul %220, %221, %cst_203 {dimension_numbers = #tpu.dot_dimension_numbers<[1], [0], [0], [1], [0, 0, 1, 1], [], []>} : vector<8x3xf32>, vector<3x48xf32>, vector<8x48xf32> -> vector<8x48xf32>
    %223 = arith.mulf %222, %199 : vector<8x48xf32>
    %c0_204 = arith.constant 0 : index
    %c0_205 = arith.constant 0 : index
    %224 = vector.load %arg13[%c0_204, %c0_205] : memref<48x16xf32, #tpu.memory_space<vmem>>, vector<48x16xf32>
    %cst_206 = arith.constant dense<0.000000e+00> : vector<8x16xf32>
    %225 = tpu.matmul %223, %224, %cst_206 {dimension_numbers = #tpu.dot_dimension_numbers<[1], [0], [0], [1], [0, 0, 1, 1], [], []>} : vector<8x48xf32>, vector<48x16xf32>, vector<8x16xf32> -> vector<8x16xf32>
    %c0_207 = arith.constant 0 : index
    %c0_208 = arith.constant 0 : index
    %c0_209 = arith.constant 0 : index
    %226 = vector.load %arg14[%c0_207, %c0_208, %c0_209] : memref<2x16x16xf32, #tpu.memory_space<vmem>>, vector<1x16x16xf32>
    %227 = vector.shape_cast %226 : vector<1x16x16xf32> to vector<16x16xf32>
    %cst_210 = arith.constant dense<0.000000e+00> : vector<8x16xf32>
    %228 = tpu.matmul %225, %227, %cst_210 {dimension_numbers = #tpu.dot_dimension_numbers<[1], [0], [0], [1], [0, 0, 1, 1], [], []>} : vector<8x16xf32>, vector<16x16xf32>, vector<8x16xf32> -> vector<8x16xf32>
    %c0_211 = arith.constant 0 : index
    %c0_212 = arith.constant 0 : index
    %c0_213 = arith.constant 0 : index
    %229 = vector.load %arg15[%c0_211, %c0_212, %c0_213] : memref<2x1x16xf32, #tpu.memory_space<vmem>>, vector<1x1x16xf32>
    %230 = vector.shape_cast %229 : vector<1x1x16xf32> to vector<1x16xf32>
    %231 = vector.broadcast %230 : vector<1x16xf32> to vector<8x16xf32>
    %232 = arith.addf %228, %231 : vector<8x16xf32>
    %cst_214 = arith.constant 0.000000e+00 : f32
    %233 = vector.broadcast %cst_214 : f32 to vector<8x16xf32>
    %234 = arith.maximumf %232, %233 : vector<8x16xf32>
    %c0_215 = arith.constant 0 : index
    %c0_216 = arith.constant 0 : index
    %c0_217 = arith.constant 0 : index
    %235 = vector.load %arg16[%c0_215, %c0_216, %c0_217] : memref<2x16x8xf32, #tpu.memory_space<vmem>>, vector<1x16x8xf32>
    %236 = vector.shape_cast %235 : vector<1x16x8xf32> to vector<16x8xf32>
    %cst_218 = arith.constant dense<0.000000e+00> : vector<8x8xf32>
    %237 = tpu.matmul %234, %236, %cst_218 {dimension_numbers = #tpu.dot_dimension_numbers<[1], [0], [0], [1], [0, 0, 1, 1], [], []>} : vector<8x16xf32>, vector<16x8xf32>, vector<8x8xf32> -> vector<8x8xf32>
    %c0_219 = arith.constant 0 : index
    %c0_220 = arith.constant 0 : index
    %c0_221 = arith.constant 0 : index
    %238 = vector.load %arg17[%c0_219, %c0_220, %c0_221] : memref<2x1x8xf32, #tpu.memory_space<vmem>>, vector<1x1x8xf32>
    %239 = vector.shape_cast %238 : vector<1x1x8xf32> to vector<1x8xf32>
    %240 = vector.broadcast %239 : vector<1x8xf32> to vector<8x8xf32>
    %241 = arith.addf %237, %240 : vector<8x8xf32>
    %cst_222 = arith.constant 0.000000e+00 : f32
    %242 = vector.broadcast %cst_222 : f32 to vector<8x8xf32>
    %243 = arith.maximumf %241, %242 : vector<8x8xf32>
    %c0_223 = arith.constant 0 : index
    %c0_224 = arith.constant 0 : index
    %c0_225 = arith.constant 0 : index
    %244 = vector.load %arg18[%c0_223, %c0_224, %c0_225] : memref<2x1x8xf32, #tpu.memory_space<vmem>>, vector<1x1x8xf32>
    %245 = vector.shape_cast %244 : vector<1x1x8xf32> to vector<1x8xf32>
    %cst_226 = arith.constant dense<0.000000e+00> : vector<1x8xf32>
    %246 = tpu.matmul %245, %243, %cst_226 {dimension_numbers = #tpu.dot_dimension_numbers<[1], [1], [0], [0], [0, 0, 1, 0], [], []>} : vector<1x8xf32>, vector<8x8xf32>, vector<1x8xf32> -> vector<1x8xf32>
    %c0_227 = arith.constant 0 : index
    %c0_228 = arith.constant 0 : index
    %c0_229 = arith.constant 0 : index
    %247 = vector.load %arg19[%c0_227, %c0_228, %c0_229] : memref<2x1x1xf32, #tpu.memory_space<vmem>>, vector<1x1x1xf32>
    %248 = vector.shape_cast %247 : vector<1x1x1xf32> to vector<1x1xf32>
    %249 = vector.broadcast %248 : vector<1x1xf32> to vector<1x8xf32>
    %250 = arith.addf %246, %249 : vector<1x8xf32>
    %251 = vector.extract_strided_slice %210 {offsets = [0, 3], sizes = [8, 3], strides = [1, 1]} : vector<8x6xf32> to vector<8x3xf32>
    %cst_230 = arith.constant dense<0xFF800000> : vector<8xf32>
    %252 = vector.multi_reduction <maximumf>, %251, %cst_230 [1] : vector<8x3xf32> to vector<8xf32>
    %253 = vector.shape_cast %252 : vector<8xf32> to vector<8x1xf32>
    %254 = vector.broadcast %253 : vector<8x1xf32> to vector<8x3xf32>
    %255 = arith.subf %251, %254 : vector<8x3xf32>
    %256 = math.exp %255 : vector<8x3xf32>
    %cst_231 = arith.constant dense<0.000000e+00> : vector<8xf32>
    %257 = vector.multi_reduction <add>, %256, %cst_231 [1] : vector<8x3xf32> to vector<8xf32>
    %258 = vector.shape_cast %257 : vector<8xf32> to vector<8x1xf32>
    %259 = vector.broadcast %258 : vector<8x1xf32> to vector<8x3xf32>
    %260 = arith.divf %256, %259 : vector<8x3xf32>
    %c0_232 = arith.constant 0 : index
    %c0_233 = arith.constant 0 : index
    %261 = vector.load %arg12[%c0_232, %c0_233] : memref<3x48xf32, #tpu.memory_space<vmem>>, vector<3x48xf32>
    %cst_234 = arith.constant dense<0.000000e+00> : vector<8x48xf32>
    %262 = tpu.matmul %260, %261, %cst_234 {dimension_numbers = #tpu.dot_dimension_numbers<[1], [0], [0], [1], [0, 0, 1, 1], [], []>} : vector<8x3xf32>, vector<3x48xf32>, vector<8x48xf32> -> vector<8x48xf32>
    %263 = arith.mulf %262, %199 : vector<8x48xf32>
    %c0_235 = arith.constant 0 : index
    %c0_236 = arith.constant 0 : index
    %264 = vector.load %arg13[%c0_235, %c0_236] : memref<48x16xf32, #tpu.memory_space<vmem>>, vector<48x16xf32>
    %cst_237 = arith.constant dense<0.000000e+00> : vector<8x16xf32>
    %265 = tpu.matmul %263, %264, %cst_237 {dimension_numbers = #tpu.dot_dimension_numbers<[1], [0], [0], [1], [0, 0, 1, 1], [], []>} : vector<8x48xf32>, vector<48x16xf32>, vector<8x16xf32> -> vector<8x16xf32>
    %c1 = arith.constant 1 : index
    %c0_238 = arith.constant 0 : index
    %c0_239 = arith.constant 0 : index
    %266 = vector.load %arg14[%c1, %c0_238, %c0_239] : memref<2x16x16xf32, #tpu.memory_space<vmem>>, vector<1x16x16xf32>
    %267 = vector.shape_cast %266 : vector<1x16x16xf32> to vector<16x16xf32>
    %cst_240 = arith.constant dense<0.000000e+00> : vector<8x16xf32>
    %268 = tpu.matmul %265, %267, %cst_240 {dimension_numbers = #tpu.dot_dimension_numbers<[1], [0], [0], [1], [0, 0, 1, 1], [], []>} : vector<8x16xf32>, vector<16x16xf32>, vector<8x16xf32> -> vector<8x16xf32>
    %c1_241 = arith.constant 1 : index
    %c0_242 = arith.constant 0 : index
    %c0_243 = arith.constant 0 : index
    %269 = vector.load %arg15[%c1_241, %c0_242, %c0_243] : memref<2x1x16xf32, #tpu.memory_space<vmem>>, vector<1x1x16xf32>
    %270 = vector.shape_cast %269 : vector<1x1x16xf32> to vector<1x16xf32>
    %271 = vector.broadcast %270 : vector<1x16xf32> to vector<8x16xf32>
    %272 = arith.addf %268, %271 : vector<8x16xf32>
    %cst_244 = arith.constant 0.000000e+00 : f32
    %273 = vector.broadcast %cst_244 : f32 to vector<8x16xf32>
    %274 = arith.maximumf %272, %273 : vector<8x16xf32>
    %c1_245 = arith.constant 1 : index
    %c0_246 = arith.constant 0 : index
    %c0_247 = arith.constant 0 : index
    %275 = vector.load %arg16[%c1_245, %c0_246, %c0_247] : memref<2x16x8xf32, #tpu.memory_space<vmem>>, vector<1x16x8xf32>
    %276 = vector.shape_cast %275 : vector<1x16x8xf32> to vector<16x8xf32>
    %cst_248 = arith.constant dense<0.000000e+00> : vector<8x8xf32>
    %277 = tpu.matmul %274, %276, %cst_248 {dimension_numbers = #tpu.dot_dimension_numbers<[1], [0], [0], [1], [0, 0, 1, 1], [], []>} : vector<8x16xf32>, vector<16x8xf32>, vector<8x8xf32> -> vector<8x8xf32>
    %c1_249 = arith.constant 1 : index
    %c0_250 = arith.constant 0 : index
    %c0_251 = arith.constant 0 : index
    %278 = vector.load %arg17[%c1_249, %c0_250, %c0_251] : memref<2x1x8xf32, #tpu.memory_space<vmem>>, vector<1x1x8xf32>
    %279 = vector.shape_cast %278 : vector<1x1x8xf32> to vector<1x8xf32>
    %280 = vector.broadcast %279 : vector<1x8xf32> to vector<8x8xf32>
    %281 = arith.addf %277, %280 : vector<8x8xf32>
    %cst_252 = arith.constant 0.000000e+00 : f32
    %282 = vector.broadcast %cst_252 : f32 to vector<8x8xf32>
    %283 = arith.maximumf %281, %282 : vector<8x8xf32>
    %c1_253 = arith.constant 1 : index
    %c0_254 = arith.constant 0 : index
    %c0_255 = arith.constant 0 : index
    %284 = vector.load %arg18[%c1_253, %c0_254, %c0_255] : memref<2x1x8xf32, #tpu.memory_space<vmem>>, vector<1x1x8xf32>
    %285 = vector.shape_cast %284 : vector<1x1x8xf32> to vector<1x8xf32>
    %cst_256 = arith.constant dense<0.000000e+00> : vector<1x8xf32>
    %286 = tpu.matmul %285, %283, %cst_256 {dimension_numbers = #tpu.dot_dimension_numbers<[1], [1], [0], [0], [0, 0, 1, 0], [], []>} : vector<1x8xf32>, vector<8x8xf32>, vector<1x8xf32> -> vector<1x8xf32>
    %c1_257 = arith.constant 1 : index
    %c0_258 = arith.constant 0 : index
    %c0_259 = arith.constant 0 : index
    %287 = vector.load %arg19[%c1_257, %c0_258, %c0_259] : memref<2x1x1xf32, #tpu.memory_space<vmem>>, vector<1x1x1xf32>
    %288 = vector.shape_cast %287 : vector<1x1x1xf32> to vector<1x1xf32>
    %289 = vector.broadcast %288 : vector<1x1xf32> to vector<1x8xf32>
    %290 = arith.addf %286, %289 : vector<1x8xf32>
    %291 = tpu.concatenate %250, %290 in 0 : vector<1x8xf32>, vector<1x8xf32> -> vector<2x8xf32>
    %c0_260 = arith.constant 0 : index
    %c0_261 = arith.constant 0 : index
    %292 = vector.load %arg20[%c0_260, %c0_261] : memref<2x8xf32, #tpu.memory_space<vmem>>, vector<2x8xf32>
    tpu.vector_store %arg20[%c0_260, %c0_261], %291 {strides = array<i32>} : memref<2x8xf32, #tpu.memory_space<vmem>>, vector<2x8xf32>,
    return
  }
  func.func @transform_0(%arg0: i32, %arg1: memref<8xi32, #tpu.memory_space<smem>>, %arg2: memref<8xi32, #tpu.memory_space<smem>>) -> (i32, i32) {
    %c0_i32 = arith.constant 0 : i32
    %c0_i32_0 = arith.constant 0 : i32
    return %arg0, %c0_i32 : i32, i32
  }
  func.func @transform_3(%arg0: i32, %arg1: memref<8xi32, #tpu.memory_space<smem>>, %arg2: memref<8xi32, #tpu.memory_space<smem>>) -> (i32, i32) {
    %c0_i32 = arith.constant 0 : i32
    %c0_i32_0 = arith.constant 0 : i32
    %c0_i32_1 = arith.constant 0 : i32
    return %c0_i32, %c0_i32_0 : i32, i32
  }
  func.func @transform_4(%arg0: i32, %arg1: memref<8xi32, #tpu.memory_space<smem>>, %arg2: memref<8xi32, #tpu.memory_space<smem>>) -> (i32, i32) {
    %c0_i32 = arith.constant 0 : i32
    %c0_i32_0 = arith.constant 0 : i32
    %c0_i32_1 = arith.constant 0 : i32
    return %c0_i32, %c0_i32_0 : i32, i32
  }
  func.func @transform_5(%arg0: i32, %arg1: memref<8xi32, #tpu.memory_space<smem>>, %arg2: memref<8xi32, #tpu.memory_space<smem>>) -> (i32, i32) {
    %c0_i32 = arith.constant 0 : i32
    %c0_i32_0 = arith.constant 0 : i32
    %c0_i32_1 = arith.constant 0 : i32
    return %c0_i32, %c0_i32_0 : i32, i32
  }
  func.func @transform_6(%arg0: i32, %arg1: memref<8xi32, #tpu.memory_space<smem>>, %arg2: memref<8xi32, #tpu.memory_space<smem>>) -> (i32, i32) {
    %c0_i32 = arith.constant 0 : i32
    %c0_i32_0 = arith.constant 0 : i32
    %c0_i32_1 = arith.constant 0 : i32
    return %c0_i32, %c0_i32_0 : i32, i32
  }
  func.func @transform_7(%arg0: i32, %arg1: memref<8xi32, #tpu.memory_space<smem>>, %arg2: memref<8xi32, #tpu.memory_space<smem>>) -> (i32, i32) {
    %c0_i32 = arith.constant 0 : i32
    %c0_i32_0 = arith.constant 0 : i32
    %c0_i32_1 = arith.constant 0 : i32
    return %c0_i32, %c0_i32_0 : i32, i32
  }
  func.func @transform_8(%arg0: i32, %arg1: memref<8xi32, #tpu.memory_space<smem>>, %arg2: memref<8xi32, #tpu.memory_space<smem>>) -> (i32, i32) {
    %c0_i32 = arith.constant 0 : i32
    %c0_i32_0 = arith.constant 0 : i32
    %c0_i32_1 = arith.constant 0 : i32
    return %c0_i32, %c0_i32_0 : i32, i32
  }
  func.func @transform_9(%arg0: i32, %arg1: memref<8xi32, #tpu.memory_space<smem>>, %arg2: memref<8xi32, #tpu.memory_space<smem>>) -> (i32, i32) {
    %c0_i32 = arith.constant 0 : i32
    %c0_i32_0 = arith.constant 0 : i32
    %c0_i32_1 = arith.constant 0 : i32
    return %c0_i32, %c0_i32_0 : i32, i32
  }
  func.func @transform_10(%arg0: i32, %arg1: memref<8xi32, #tpu.memory_space<smem>>, %arg2: memref<8xi32, #tpu.memory_space<smem>>) -> (i32, i32) {
    %c0_i32 = arith.constant 0 : i32
    %c0_i32_0 = arith.constant 0 : i32
    %c0_i32_1 = arith.constant 0 : i32
    return %c0_i32, %c0_i32_0 : i32, i32
  }
  func.func @transform_11(%arg0: i32, %arg1: memref<8xi32, #tpu.memory_space<smem>>, %arg2: memref<8xi32, #tpu.memory_space<smem>>) -> (i32, i32, i32) {
    %c0_i32 = arith.constant 0 : i32
    %c0_i32_0 = arith.constant 0 : i32
    %c0_i32_1 = arith.constant 0 : i32
    %c0_i32_2 = arith.constant 0 : i32
    return %c0_i32, %c0_i32_0, %c0_i32_1 : i32, i32, i32
  }
  func.func @transform_12(%arg0: i32, %arg1: memref<8xi32, #tpu.memory_space<smem>>, %arg2: memref<8xi32, #tpu.memory_space<smem>>) -> (i32, i32, i32) {
    %c0_i32 = arith.constant 0 : i32
    %c0_i32_0 = arith.constant 0 : i32
    %c0_i32_1 = arith.constant 0 : i32
    %c0_i32_2 = arith.constant 0 : i32
    return %c0_i32, %c0_i32_0, %c0_i32_1 : i32, i32, i32
  }
  func.func @transform_13(%arg0: i32, %arg1: memref<8xi32, #tpu.memory_space<smem>>, %arg2: memref<8xi32, #tpu.memory_space<smem>>) -> (i32, i32, i32) {
    %c0_i32 = arith.constant 0 : i32
    %c0_i32_0 = arith.constant 0 : i32
    %c0_i32_1 = arith.constant 0 : i32
    %c0_i32_2 = arith.constant 0 : i32
    return %c0_i32, %c0_i32_0, %c0_i32_1 : i32, i32, i32
  }
  func.func @transform_14(%arg0: i32, %arg1: memref<8xi32, #tpu.memory_space<smem>>, %arg2: memref<8xi32, #tpu.memory_space<smem>>) -> (i32, i32, i32) {
    %c0_i32 = arith.constant 0 : i32
    %c0_i32_0 = arith.constant 0 : i32
    %c0_i32_1 = arith.constant 0 : i32
    %c0_i32_2 = arith.constant 0 : i32
    return %c0_i32, %c0_i32_0, %c0_i32_1 : i32, i32, i32
  }
  func.func @transform_15(%arg0: i32, %arg1: memref<8xi32, #tpu.memory_space<smem>>, %arg2: memref<8xi32, #tpu.memory_space<smem>>) -> (i32, i32, i32) {
    %c0_i32 = arith.constant 0 : i32
    %c0_i32_0 = arith.constant 0 : i32
    %c0_i32_1 = arith.constant 0 : i32
    %c0_i32_2 = arith.constant 0 : i32
    return %c0_i32, %c0_i32_0, %c0_i32_1 : i32, i32, i32
  }
  func.func @transform_16(%arg0: i32, %arg1: memref<8xi32, #tpu.memory_space<smem>>, %arg2: memref<8xi32, #tpu.memory_space<smem>>) -> (i32, i32, i32) {
    %c0_i32 = arith.constant 0 : i32
    %c0_i32_0 = arith.constant 0 : i32
    %c0_i32_1 = arith.constant 0 : i32
    %c0_i32_2 = arith.constant 0 : i32
    return %c0_i32, %c0_i32_0, %c0_i32_1 : i32, i32, i32
  }
  func.func @transform_17(%arg0: i32, %arg1: memref<8xi32, #tpu.memory_space<smem>>, %arg2: memref<8xi32, #tpu.memory_space<smem>>) -> (i32, i32) {
    %c0_i32 = arith.constant 0 : i32
    %c0_i32_0 = arith.constant 0 : i32
    return %c0_i32, %arg0 : i32, i32
  }
}

</mosaic_0001>

<bundles_post_ra>
// kernel: tpu_custom_call.1
= control target key start
LH: loop header
LB: loop body
LE: loop exit
PB: predicated region body
PF: predicated region fallthrough
CT: control target
= control target key end

     0   :  { %s3464_s0 = inlined_call_operand.vmem [shape: s32[8], index: 0, kind: input, shape index: {}]   ;;  %s3465_s2 = inlined_call_operand.vmem [shape: f32[8,4], index: 2, kind: input, shape index: {}]   ;;  %s3466_s3 = inlined_call_operand.vmem [shape: f32[32,16], index: 3, kind: input, shape index: {}]   ;;  %s3467_s4 = inlined_call_operand.vmem [shape: f32[64,16], index: 4, kind: input, shape index: {}]   ;;  %s3468_s5 = inlined_call_operand.vmem [shape: f32[36,96], index: 5, kind: input, shape index: {}]   ;;  %s3469_s6 = inlined_call_operand.vmem [shape: f32[1,96], index: 6, kind: input, shape index: {}]   ;;  %s3470_s7 = inlined_call_operand.vmem [shape: f32[96,48], index: 7, kind: input, shape index: {}]   ;;  %s3471_s8 = inlined_call_operand.vmem [shape: f32[1,48], index: 8, kind: input, shape index: {}]   ;;  %s3472_s9 = inlined_call_operand.vmem [shape: f32[36,6], index: 9, kind: input, shape index: {}]   ;;  %s3473_s10 = inlined_call_operand.vmem [shape: f32[1,6], index: 10, kind: input, shape index: {}]   ;;  %s3474_s11 = inlined_call_operand.vmem [shape: f32[3,48], index: 11, kind: input, shape index: {}]   ;;  %s3475_s12 = inlined_call_operand.vmem [shape: f32[48,16], index: 12, kind: input, shape index: {}]   ;;  %s3476_s13 = inlined_call_operand.vmem [shape: f32[2,16,16], index: 13, kind: input, shape index: {}]   ;;  %s3477_s14 = inlined_call_operand.vmem [shape: f32[2,1,16], index: 14, kind: input, shape index: {}]   ;;  %s3478_s15 = inlined_call_operand.vmem [shape: f32[2,16,8], index: 15, kind: input, shape index: {}]   ;;  %s3479_s16 = inlined_call_operand.vmem [shape: f32[2,1,8], index: 16, kind: input, shape index: {}]   ;;  %s3480_s17 = inlined_call_operand.vmem [shape: f32[2,1,8], index: 17, kind: input, shape index: {}]   ;;  %s3481_s18 = inlined_call_operand.vmem [shape: f32[2,1,1], index: 18, kind: input, shape index: {}]   ;;  %s3482_s19 = inlined_call_operand.hbm [shape: f32[2,8], index: 19, kind: output, shape index: {}]   ;;  %s3483_s1 = inlined_call_operand.vmem [shape: s32[8], index: 1, kind: input, shape index: {}]  }
   0x1   :  { %3487 = sst [smem:[#allocation44_spill]] %s3464_s0  ;;  %s28_s22 = sshll.u32 %s3483_s1, 4  ;;  %s29_s22 = int_to_ptr.vmem [resolvable:$true] %s28_s22 }
   0x2   :  { %3488 = sst [smem:[#allocation45_spill]] %s3465_s2  ;;  %s3492_s20 = sld [smem:[#allocation44_spill]] }
   0x3   :  { %3489 = sst [smem:[#allocation46_spill]] %s3466_s3 }
   0x4   :  { %3490 = sst [smem:[#allocation47_spill]] %s3467_s4 }
   0x5   :  { %3491 = sst [smem:[#allocation48_spill]] %s3477_s14 }
   0x8   :  { %s24_s14 = sshll.u32 %s3492_s20, 4  ;;  %s25_s14 = int_to_ptr.vmem [resolvable:$true] %s24_s14 }
   0x9   :  { %s2958_s3 = scalar_lea.vmem %s25_s14, 16  ;;  %p2963_p1 = scmp.lt.s32.totalorder %s25_s14, %s25_s14 }
   0xa   :  { %p2959_p0 = scmp.ne.s32.totalorder %s25_s14, %s2958_s3  ;;  %p2964_p2 = scmp.lt.s32.totalorder %s2958_s3, %s2958_s3 }
   0xc   :  { %p2965_p3 = por %p2964_p2, %p2963_p1 }
   0xe   :  { %p2966_p4 = pnand %p2965_p3, %p2959_p0 }
  0x10   :  { %2969 = shalt.err (!%p2966_p4)  }
  0x11   :  { %s3040_s23 = smov [#allocation6]   ;;  %s2970_s24 = scalar_lea.vmem %s29_s22, 16 }
  0x12   :  { %27 = dma.vmem_to_smem %s25_s14, 16, %s3040_s23, [#allocation5] }
  0x13   :  { %p2971_p5 = scmp.ne.s32.totalorder %s29_s22, %s2970_s24  ;;  %p2975_p6 = scmp.lt.s32.totalorder %s29_s22, %s29_s22 }
  0x14   :  { %p2976_p7 = scmp.lt.s32.totalorder %s2970_s24, %s2970_s24 }
  0x16   :  { %p2977_p8 = por %p2976_p7, %p2975_p6 }
  0x18   :  { %p2978_p9 = pnand %p2977_p8, %p2971_p5 }
  0x1a   :  { %2981 = shalt.err (!%p2978_p9)  }
  0x1b   :  { %s3041_s25 = smov [#allocation7]  }
  0x1c   :  { %31 = dma.vmem_to_smem %s29_s22, 16, %s3041_s25, [#allocation5] }
  0x1d   :  { %3004 = dma.done.wait [#allocation5], 32 }
  0x1e   :  { %3005 = vsyncadd [#allocation5], 4294967264 }
  0x1f   :  { %33 = sfence }
  0x20   :  { %34 = vsyncpa [#allocation9], 0  ;;  %s66_s1 = sld [smem:[#allocation6]]  ;;  %s3493_s28 = sld [smem:[#allocation46_spill]] }
  0x21   :  { %s67_s4 = sld [smem:[#allocation7]] }
  0x26   :  { %s68_s29 = scalar_lea.vmem %s3493_s28, %s66_s1 }
  0x27   :  { %v86_v0 = vld [vmem:[%s68_s29] sm:$0x1] }
  0x28   :  { %87 = vst [vmem:[#allocation2] sm:$0x1] %v86_v0 }
  0x29   :  { %112 = vsyncadd [#allocation4], 16  ;;  %s3494_s30 = sld [smem:[#allocation47_spill]] }
  0x2f   :  { %s113_s20 = scalar_lea.vmem %s3494_s30, %s67_s4 }
  0x30   :  { %v132_v1 = vld [vmem:[%s113_s20] sm:$0x1] }
  0x31   :  { %133 = vst [vmem:[#allocation3] sm:$0x1] %v132_v1 }
  0x32   :  { %158 = vsyncadd [#allocation4 + $0x8], 16  ;;  %s2606_s21 = sld [smem:[#allocation6 + $0x1]] }
  0x33   :  { %s2607_s2 = sld [smem:[#allocation7 + $0x1]] }
  0x38   :  { %s162_s23 = scalar_lea.vmem %s3493_s28, %s2606_s21 }
  0x39   :  { %v182_v2 = vld [vmem:[%s162_s23] sm:$0x1] }
  0x3a   :  { %183 = vst [vmem:[#allocation2 + $0x1] sm:$0x1] %v182_v2 }
  0x3b   :  { %208 = vsyncadd [#allocation4 + $0x1], 16  ;;  %s209_s1 = scalar_lea.vmem %s3494_s30, %s2607_s2 }
  0x3c   :  { %v229_v3 = vld [vmem:[%s209_s1] sm:$0x1] }
  0x3d   :  { %230 = vst [vmem:[#allocation3 + $0x1] sm:$0x1] %v229_v3 }
  0x3e   :  { %255 = vsyncadd [#allocation4 + $0x9], 16  ;;  %s2608_s4 = sld [smem:[#allocation6 + $0x2]] }
  0x3f   :  { %s2609_s26 = sld [smem:[#allocation7 + $0x2]] }
  0x44   :  { %s259_s14 = scalar_lea.vmem %s3493_s28, %s2608_s4 }
  0x45   :  { %v279_v4 = vld [vmem:[%s259_s14] sm:$0x1] }
  0x46   :  { %280 = vst [vmem:[#allocation2 + $0x2] sm:$0x1] %v279_v4 }
  0x47   :  { %305 = vsyncadd [#allocation4 + $0x2], 16  ;;  %s306_s21 = scalar_lea.vmem %s3494_s30, %s2609_s26 }
  0x48   :  { %v326_v5 = vld [vmem:[%s306_s21] sm:$0x1] }
  0x49   :  { %327 = vst [vmem:[#allocation3 + $0x2] sm:$0x1] %v326_v5 }
  0x4a   :  { %352 = vsyncadd [#allocation4 + $0xa], 16  ;;  %s2610_s2 = sld [smem:[#allocation6 + $0x3]] }
  0x4b   :  { %s2611_s22 = sld [smem:[#allocation7 + $0x3]] }
  0x50   :  { %s356_s24 = scalar_lea.vmem %s3493_s28, %s2610_s2 }
  0x51   :  { %v376_v6 = vld [vmem:[%s356_s24] sm:$0x1] }
  0x52   :  { %377 = vst [vmem:[#allocation2 + $0x3] sm:$0x1] %v376_v6 }
  0x53   :  { %402 = vsyncadd [#allocation4 + $0x3], 16  ;;  %s403_s4 = scalar_lea.vmem %s3494_s30, %s2611_s22 }
  0x54   :  { %v423_v7 = vld [vmem:[%s403_s4] sm:$0x1] }
  0x55   :  { %424 = vst [vmem:[#allocation3 + $0x3] sm:$0x1] %v423_v7 }
  0x56   :  { %449 = vsyncadd [#allocation4 + $0xb], 16  ;;  %s2612_s26 = sld [smem:[#allocation6 + $0x4]] }
  0x57   :  { %s2613_s27 = sld [smem:[#allocation7 + $0x4]] }
  0x5c   :  { %s453_s0 = scalar_lea.vmem %s3493_s28, %s2612_s26 }
  0x5d   :  { %v473_v8 = vld [vmem:[%s453_s0] sm:$0x1] }
  0x5e   :  { %474 = vst [vmem:[#allocation2 + $0x4] sm:$0x1] %v473_v8 }
  0x5f   :  { %499 = vsyncadd [#allocation4 + $0x4], 16  ;;  %s500_s2 = scalar_lea.vmem %s3494_s30, %s2613_s27 }
  0x60   :  { %v520_v9 = vld [vmem:[%s500_s2] sm:$0x1] }
  0x61   :  { %521 = vst [vmem:[#allocation3 + $0x4] sm:$0x1] %v520_v9 }
  0x62   :  { %546 = vsyncadd [#allocation4 + $0xc], 16  ;;  %s2614_s22 = sld [smem:[#allocation6 + $0x5]] }
  0x63   :  { %s2615_s3 = sld [smem:[#allocation7 + $0x5]] }
  0x68   :  { %s550_s25 = scalar_lea.vmem %s3493_s28, %s2614_s22 }
  0x69   :  { %v570_v10 = vld [vmem:[%s550_s25] sm:$0x1] }
  0x6a   :  { %571 = vst [vmem:[#allocation2 + $0x5] sm:$0x1] %v570_v10 }
  0x6b   :  { %596 = vsyncadd [#allocation4 + $0x5], 16  ;;  %s597_s26 = scalar_lea.vmem %s3494_s30, %s2615_s3 }
  0x6c   :  { %v617_v11 = vld [vmem:[%s597_s26] sm:$0x1] }
  0x6d   :  { %618 = vst [vmem:[#allocation3 + $0x5] sm:$0x1] %v617_v11 }
  0x6e   :  { %643 = vsyncadd [#allocation4 + $0xd], 16  ;;  %s2616_s27 = sld [smem:[#allocation6 + $0x6]] }
  0x6f   :  { %s2617_s29 = sld [smem:[#allocation7 + $0x6]] }
  0x74   :  { %s647_s20 = scalar_lea.vmem %s3493_s28, %s2616_s27 }
  0x75   :  { %v667_v12 = vld [vmem:[%s647_s20] sm:$0x1] }
  0x76   :  { %668 = vst [vmem:[#allocation2 + $0x6] sm:$0x1] %v667_v12 }
  0x77   :  { %693 = vsyncadd [#allocation4 + $0x6], 16  ;;  %s694_s22 = scalar_lea.vmem %s3494_s30, %s2617_s29 }
  0x78   :  { %v714_v13 = vld [vmem:[%s694_s22] sm:$0x1] }
  0x79   :  { %715 = vst [vmem:[#allocation3 + $0x6] sm:$0x1] %v714_v13 }
  0x7a   :  { %740 = vsyncadd [#allocation4 + $0xe], 16  ;;  %s2618_s3 = sld [smem:[#allocation6 + $0x7]] }
  0x7b   :  { %s2619_s23 = sld [smem:[#allocation7 + $0x7]] }
  0x80   :  { %s744_s1 = scalar_lea.vmem %s3493_s28, %s2618_s3 }
  0x81   :  { %v764_v14 = vld [vmem:[%s744_s1] sm:$0x1] }
  0x82   :  { %765 = vst [vmem:[#allocation2 + $0x7] sm:$0x1] %v764_v14 }
  0x83   :  { %790 = vsyncadd [#allocation4 + $0x7], 16  ;;  %s791_s27 = scalar_lea.vmem %s3494_s30, %s2619_s23 }
  0x84   :  { %v811_v15 = vld [vmem:[%s791_s27] sm:$0x1] }
  0x85   :  { %812 = vst [vmem:[#allocation3 + $0x7] sm:$0x1] %v811_v15 }
  0x86   :  { %837 = vsyncadd [#allocation4 + $0xf], 16 }
  0x87   :  { %3006 = dma.done.wait [#allocation4], 16 }
  0x88   :  { %3007 = vsyncadd [#allocation4], 4294967280 }
  0x89   :  { %3008 = dma.done.wait [#allocation4 + $0x8], 16 }
  0x8a   :  { %3009 = vsyncadd [#allocation4 + $0x8], 4294967280 }
  0x8b   :  { %3010 = dma.done.wait [#allocation4 + $0x1], 16 }
  0x8c   :  { %3011 = vsyncadd [#allocation4 + $0x1], 4294967280 }
  0x8d   :  { %3012 = dma.done.wait [#allocation4 + $0x9], 16 }
  0x8e   :  { %3013 = vsyncadd [#allocation4 + $0x9], 4294967280 }
  0x8f   :  { %3014 = dma.done.wait [#allocation4 + $0x2], 16 }
  0x90   :  { %3015 = vsyncadd [#allocation4 + $0x2], 4294967280 }
  0x91   :  { %3016 = dma.done.wait [#allocation4 + $0xa], 16 }
  0x92   :  { %3017 = vsyncadd [#allocation4 + $0xa], 4294967280 }
  0x93   :  { %3018 = dma.done.wait [#allocation4 + $0x3], 16 }
  0x94   :  { %3019 = vsyncadd [#allocation4 + $0x3], 4294967280 }
  0x95   :  { %3020 = dma.done.wait [#allocation4 + $0xb], 16 }
  0x96   :  { %3021 = vsyncadd [#allocation4 + $0xb], 4294967280 }
  0x97   :  { %3022 = dma.done.wait [#allocation4 + $0x4], 16 }
  0x98   :  { %3023 = vsyncadd [#allocation4 + $0x4], 4294967280 }
  0x99   :  { %3024 = dma.done.wait [#allocation4 + $0xc], 16 }
  0x9a   :  { %3025 = vsyncadd [#allocation4 + $0xc], 4294967280 }
  0x9b   :  { %3026 = dma.done.wait [#allocation4 + $0x5], 16 }
  0x9c   :  { %3027 = vsyncadd [#allocation4 + $0x5], 4294967280 }
  0x9d   :  { %3028 = dma.done.wait [#allocation4 + $0xd], 16 }
  0x9e   :  { %3029 = vsyncadd [#allocation4 + $0xd], 4294967280 }
  0x9f   :  { %3030 = dma.done.wait [#allocation4 + $0x6], 16 }
  0xa0   :  { %3031 = vsyncadd [#allocation4 + $0x6], 4294967280 }
  0xa1   :  { %3032 = dma.done.wait [#allocation4 + $0xe], 16 }
  0xa2   :  { %3033 = vsyncadd [#allocation4 + $0xe], 4294967280 }
  0xa3   :  { %3034 = dma.done.wait [#allocation4 + $0x7], 16 }
  0xa4   :  { %3035 = vsyncadd [#allocation4 + $0x7], 4294967280 }
  0xa5   :  { %3036 = dma.done.wait [#allocation4 + $0xf], 16 }
  0xa6   :  { %3037 = vsyncadd [#allocation4 + $0xf], 4294967280  ;;  %v3042_v16 = vmov 0.0|0.0   ;;  %vm3043_vm0 = vmmov 0   ;;  %v3044_v17 = vmov 0.0   ;;  %v876_v18 = vld [vmem:[%s3468_s5 + $0x10] sm:$0xff] }
  0xa7   :  { %2880 = vmatprep.subr.bf16.mxu0 %v3042_v16  ;;  %2883 = vmatprep.subr.bf16.mxu1 %v3042_v16  ;;  %v877_v19 = vld [vmem:[%s3468_s5 + $0x18] sm:$0xff]  ;;  %v874_v20 = vld [vmem:[%s3468_s5] sm:$0xff]  ;;  %v875_v22 = vld [vmem:[%s3468_s5 + $0x8] sm:$0xff]  ;;  %vm878_vm1 = vcmask 130048   ;;  %vm1030_vm2 = vcmask 1043456   ;;  %s3495_s21 = sld [smem:[#allocation45_spill]] }
  0xa8   :  { %2741 = vmatprep.mubr.msk.f32.mxu0 %vm3043_vm0, %v3044_v17  ;;  %2748 = vmatprep.mubr.msk.f32.mxu1 %vm3043_vm0, %v3044_v17  ;;  %v2881_v21 = vpack.c.bf16 %v877_v19, %v876_v18  ;;  %v2884_v23 = vpack.c.bf16 %v875_v22, %v874_v20  ;;  %v872_v24 = vld [vmem:[#allocation3] sm:$0xff]  ;;  %v871_v25 = vld [vmem:[#allocation2] sm:$0xff]  ;;  %v1210_v27 = vld [vmem:[%s3472_s9 + $0x10] sm:$0xff]  ;;  %vm1026_vm3 = vcmask 31744   ;;  %vm1133_vm4 = vcmask 785408   ;;  %s3496_s1 = sld [smem:[#allocation48_spill]] }
  0xa9   :  { %v1025_v26 = vld [vmem:[%s3468_s5 + $0x20] sm:$0xf]  ;;  %v1211_v28 = vld [vmem:[%s3472_s9 + $0x18] sm:$0xff]  ;;  %v1115_v30 = vld [vmem:[%s3470_s7 + $0x8] sm:$0xff]  ;;  %vm1860_vm5 = vcmask 48152   ;;  %vm1435_vm6 = vcmask 23552  }
  0xaa   :  { %2882 = vmatpush3.bf16.msra.mxu0 %v2881_v21  ;;  %2885 = vmatpush3.bf16.msra.mxu1 %v2884_v23  ;;  %v1114_v29 = vld [vmem:[%s3470_s7] sm:$0xff]  ;;  %v1116_v32 = vld [vmem:[%s3470_s7 + $0x10] sm:$0xff]  ;;  %v1117_v33 = vld [vmem:[%s3470_s7 + $0x18] sm:$0xff]  ;;  %v2905_v35 = vpack.c.bf16 %v1211_v28, %v1210_v27  ;;  %vm1451_vm7 = vcmask 1042432   ;;  %vm1532_vm8 = vcmask 392192   ;;  %vm1783_vm9 = vcmask 64512  }
  0xab   :  { %2751 = vmatprep.subr.mxu0 %v3044_v17  ;;  %2886 = vmatprep.subr.bf16.mxu1 %v3042_v16  ;;  %v2887_v31 = vpack.c.bf16 %v1115_v30, %v1114_v29  ;;  %v1208_v36 = vld [vmem:[%s3472_s9] sm:$0xff]  ;;  %v1209_v37 = vld [vmem:[%s3472_s9 + $0x8] sm:$0xff]  ;;  %v2890_v38 = vpack.c.bf16 %v1117_v33, %v1116_v32  ;;  %v1120_v44 = vld [vmem:[%s3470_s7 + $0x30] sm:$0xff]  ;;  %vm2287_vm10 = vcmask 1040384   ;;  %vm2289_vm11 = vcmask 58368  }
  0xac   :  { %v1118_v39 = vld [vmem:[%s3470_s7 + $0x20] sm:$0xff]  ;;  %v1119_v40 = vld [vmem:[%s3470_s7 + $0x28] sm:$0xff]  ;;  %v2908_v41 = vpack.c.bf16 %v1209_v37, %v1208_v36  ;;  %v1121_v45 = vld [vmem:[%s3470_s7 + $0x38] sm:$0xff] }
  0xad   :  { %2742 = vmatmul.mubr.msk.f32.vlgmr.msra.gmra.mrb[0].mxu0 %vm878_vm1, %v872_v24  ;;  %2749 = vmatmul.mubr.msk.f32.vlgmr.msra.gmra.mrb[0].mxu1 %vm878_vm1, %v871_v25  ;;  %v873_v34 = vld [vmem:[%s3495_s21] sm:$0xff]  ;;  %v2893_v42 = vpack.c.bf16 %v1119_v40, %v1118_v39  ;;  %v2896_v46 = vpack.c.bf16 %v1121_v45, %v1120_v44  ;;  %v1123_v48 = vld [vmem:[%s3470_s7 + $0x48] sm:$0xff]  ;;  %v1124_v50 = vld [vmem:[%s3470_s7 + $0x50] sm:$0xff] }
  0xae   :  { %2752 = vmatpush3.msk.msra.mxu0 %vm1030_vm2, %v1025_v26  ;;  %2753 = vmatprep.mubr.msk.f32.mxu0 %vm3043_vm0, %v3044_v17  ;;  %v1352_v43 = vld [vmem:[%s3472_s9 + $0x20] sm:$0xf]  ;;  %v1125_v51 = vld [vmem:[%s3470_s7 + $0x58] sm:$0xff]  ;;  %v1527_v30 = vld [vmem:[%s3475_s12 + $0x8] sm:$0xff] }
  0xaf   :  { %2904 = vmatprep.subr.bf16.mxu0 %v3042_v16  ;;  %2888 = vmatpush3.bf16.msra.mxu1 %v2887_v31  ;;  %v1122_v47 = vld [vmem:[%s3470_s7 + $0x40] sm:$0xff]  ;;  %v2902_v52 = vpack.c.bf16 %v1125_v51, %v1124_v50 }
  0xb0   :  { %2780 = vmatprep.mubr.msk.f32.mxu1 %vm3043_vm0, %v3044_v17  ;;  %2889 = vmatprep.subr.bf16.mxu1 %v3042_v16  ;;  %v2899_v49 = vpack.c.bf16 %v1123_v48, %v1122_v47  ;;  %v2624_v59 = vld [vmem:[%s3469_s6] ss:$0 sm:$0xff]  ;;  %s3045_s6 = smov 125  }
  0xb1   :  { %2754 = vmatmul.mubr.msk.f32.vlgmr.msra.gmra.mrb[2].mxu0 %vm1026_vm3, %v873_v34  ;;  %v2631_v6 = vld [vmem:[%s3473_s10] ss:$0 sm:$0xff] }
  0xb2   :  { %2906 = vmatpush3.bf16.msra.mxu0 %v2905_v35  ;;  %2787 = vmatprep.mubr.msk.f32.mxu0 %vm3043_vm0, %v3044_v17  ;;  %v3323_v23 = vld [vmem:[%s3474_s11] sm:$0x7]  ;;  %v1529_v35 = vld [vmem:[%s3475_s12 + $0x18] sm:$0xff] }
  0xb3   :  { %2907 = vmatprep.subr.bf16.mxu0 %v3042_v16  ;;  %2891 = vmatpush3.bf16.msra.mxu1 %v2890_v38  ;;  %v1526_v29 = vld [vmem:[%s3475_s12] sm:$0xff]  ;;  %v1531_v38 = vld [vmem:[%s3475_s12 + $0x28] sm:$0xff] }
  0xb4   :  { %2892 = vmatprep.subr.bf16.mxu1 %v3042_v16  ;;  %v3335_v32 = vpack.c.bf16 %v1527_v30, %v1526_v29  ;;  %v1530_v37 = vld [vmem:[%s3475_s12 + $0x20] sm:$0xff] }
  0xb5   :  { %2788 = vmatmul.mubr.msk.f32.vlgmr.msra.gmra.mrb[4].mxu0 %vm878_vm1, %v872_v24  ;;  %v3358_v39 = vpack.c.bf16 %v1531_v38, %v1530_v37 }
  0xb6   :  { %2909 = vmatpush3.bf16.msra.mxu0 %v2908_v41  ;;  %2794 = vmatprep.mubr.msk.f32.mxu0 %vm3043_vm0, %v3044_v17  ;;  %v1606_v41 = vld [vmem:[%s3476_s13] sm:$0xff] }
  0xb7   :  { %2797 = vmatprep.subr.mxu0 %v3044_v17  ;;  %2894 = vmatpush3.bf16.msra.mxu1 %v2893_v42  ;;  %v1607_v42 = vld [vmem:[%s3476_s13 + $0x8] sm:$0xff] }
  0xb8   :  { %2895 = vmatprep.subr.bf16.mxu1 %v3042_v16 }
  0xb9   :  { %2795 = vmatmul.mubr.msk.f32.vlgmr.msra.gmra.mrb[6].mxu0 %vm878_vm1, %v871_v25 }
  0xba   :  { %2798 = vmatpush3.msk.msra.mxu0 %vm1030_vm2, %v1352_v43  ;;  %2799 = vmatprep.mubr.msk.f32.mxu0 %vm3043_vm0, %v3044_v17  ;;  %v2920_v43 = vpack.c.bf16 %v1607_v42, %v1606_v41 }
  0xbb   :  { %2802 = vmatprep.subr.mxu0 %v3044_v17  ;;  %2897 = vmatpush3.bf16.msra.mxu1 %v2896_v46  ;;  %v2625_v46 = vld [vmem:[%s3471_s8] ss:$0 sm:$0xff] }
  0xbc   :  { %2898 = vmatprep.subr.bf16.mxu1 %v3042_v16 }
  0xbd   :  { %2800 = vmatmul.mubr.msk.f32.vlgmr.msra.gmra.mrb[8].mxu0 %vm1026_vm3, %v873_v34  ;;  %v1528_v34 = vld [vmem:[%s3475_s12 + $0x10] sm:$0xff] }
  0xbe   :  { %2804 = vmatprep.mubr.msk.f32.mxu0 %vm3043_vm0, %v3044_v17  ;;  %2803 = vmatpush3.msk.msra.mxu0 %vm1451_vm7, %v3323_v23  ;;  %v3345_v36 = vpack.c.bf16 %v1529_v35, %v1528_v34 }
  0xbf   :  { %2900 = vmatpush3.bf16.msra.mxu1 %v2899_v49  ;;  %2910 = vmatprep.subr.bf16.mxu0 %v3042_v16 }
  0xc0   :  { %2901 = vmatprep.subr.bf16.mxu1 %v3042_v16 }
  0xc3   :  { %2903 = vmatpush3.bf16.msra.mxu1 %v2902_v52 }
  0xc4   :  { %2919 = vmatprep.subr.bf16.mxu1 %v3042_v16 }
 0x180   :  { %v948_v53 = vpop.f32.mrb[0].mxu0  ;;  %v1021_v54 = vpop.f32.mrb[0].mxu1 }
 0x181   :  { %v2743_v55 = vpop.f32.mrb[1].mxu0  ;;  %v1022_v56 = vadd.f32 %v1021_v54, %v948_v53  ;;  %v2750_v57 = vpop.f32.mrb[1].mxu1  ;;  %v1689_v54 = vld [vmem:[%s3478_s15] sm:$0xff] }
 0x182   :  { %v1690_v55 = vld [vmem:[%s3478_s15 + $0x8] sm:$0xff]  ;;  %v2635_v57 = vld [vmem:[%s3496_s1] ss:$0 sm:$0xff] }
 0x184   :  { %v1100_v58 = vpop.f32.mrb[2].mxu0 }
 0x185   :  { %v1104_v60 = vadd.f32 %v1100_v58, %v1022_v56  ;;  %v2755_v61 = vpop.f32.mrb[3].mxu0  ;;  %v2923_v56 = vpack.c.bf16 %v1690_v55, %v1689_v54 }
 0x187   :  { %v1112_v62 = vadd.f32 %v2624_v59, %v1104_v60 }
 0x188   :  { %v1278_v63 = vpop.f32.mrb[4].mxu0 }
 0x189   :  { %v1113_v0 = vmax.f32 %v1112_v62, 0.0  ;;  %v2789_v1 = vpop.f32.mrb[5].mxu0 }
 0x18a   :  { %v1773_v1 = vld [vmem:[%s3481_s18] sm:$0x1] }
 0x18b   :  { %2781 = vmatmul.mubr.msk.f32.vlgmr.msra.gmra.mrb[2].mxu1 %vm1133_vm4, %v1113_v0  ;;  %v3046_v0 = vmov 0  }
 0x18c   :  { %v1348_v2 = vpop.f32.mrb[6].mxu0  ;;  %2826 = vmatprep.mubr.msk.f32.mxu1 %vm3043_vm0, %v3044_v17  ;;  %2921 = vmatpush3.bf16.msra.mxu1 %v2920_v43 }
 0x18d   :  { %v1349_v3 = vadd.f32 %v1348_v2, %v1278_v63  ;;  %v2796_v4 = vpop.f32.mrb[7].mxu0  ;;  %2922 = vmatprep.subr.bf16.mxu1 %v3042_v16  ;;  %v2655_v63 = vld [vmem:[%s3481_s18 + $0x1] sm:$0x1]  ;;  %2948 = vset.pattern.permute.xlu1 %v3046_v0  ;;  %v2637_v2 = vld [vmem:[%s3479_s16] ss:$0 sm:$0xff] }
 0x18e   :  { %2949 = vset.pattern.permute.xlu0 %v3046_v0 }
 0x190   :  { %v1422_v5 = vpop.f32.mrb[8].mxu0 }
 0x191   :  { %v1426_v7 = vadd.f32 %v1422_v5, %v1349_v3  ;;  %v2801_v8 = vpop.f32.mrb[9].mxu0 }
 0x193   :  { %v1434_v9 = vadd.f32 %v2631_v6, %v1426_v7 }
 0x195   :  { %v1861_v10 = vsel %vm1860_vm5, %v1434_v9, -inf  ;;  %v1436_v11 = vsel %vm1435_vm6, %v1434_v9, -inf }
 0x196   :  { %1862 = vmax.xlane.f32.xlu1 %v1861_v10  ;;  %1437 = vmax.xlane.f32.xlu0 %v1436_v11  ;;  %v2644_v11 = vld [vmem:[%s3476_s13 + $0x10] sm:$0xff] }
 0x223   :  { %v1863_v12 = vpop.xlane.xlu1 %1862  ;;  %v1438_v13 = vpop.xlane.xlu0 %1437 }
 0x224   :  { %v1864_v14 = vsub.f32 %v1434_v9, %v1863_v12  ;;  %v1439_v15 = vsub.f32 %v1434_v9, %v1438_v13  ;;  %v1772_v9 = vld [vmem:[%s3480_s17] sm:$0x1]  ;;  %v2645_v12 = vld [vmem:[%s3476_s13 + $0x18] sm:$0xff] }
 0x225   :  { %v2935_v13 = vpack.c.bf16 %v2645_v12, %v2644_v11 }
 0x226   :  { %v1865_v18 = vmul.f32 1.442695, %v1864_v14  ;;  %v1440_v19 = vmul.f32 1.442695, %v1439_v15 }
 0x228   :  { %2950 = vpow2.f32 %v1865_v18 }
 0x229   :  { %2952 = vpow2.f32 %v1440_v19 }
 0x232   :  { %v2951_v20 = vpop.eup %2950 }
 0x233   :  { %v2953_v21 = vpop.eup %2952  ;;  %1868 = vrot.lane.b32.xlu1 %v2951_v20, %s3045_s6 }
 0x234   :  { %v1442_v22 = vsel %vm1435_vm6, %v2953_v21, 0.0 }
 0x235   :  { %1443 = vadd.xlane.f32.xlu0 %v1442_v22 }
 0x237   :  { %2201 = vperm.xlu1 %2948, %v2655_v63  }
 0x23b   :  { %1776 = vperm.xlu1 %2948, %v1773_v1  }
 0x25e   :  { %v1203_v24 = vpop.f32.mrb[2].mxu1 }
 0x25f   :  { %v2782_v25 = vpop.f32.mrb[3].mxu1  ;;  %v1204_v47 = vadd.f32 %v2625_v46, %v1203_v24 }
 0x261   :  { %v1207_v48 = vmax.f32 %v1204_v47, 0.0 }
 0x2a5   :  { %v1869_v26 = vpop.permute.xlu1 %1868 }
 0x2a6   :  { %v1871_v27 = vsel %vm1435_vm6, %v1869_v26, 0.0 }
 0x2a7   :  { %1872 = vadd.xlane.f32.xlu0 %v1871_v27  ;;  %v2652_v27 = vld [vmem:[%s3479_s16 + $0x1] ss:$0 sm:$0xff]  ;;  %s3047_s16 = smov [#allocation8]  }
 0x2a8   :  { %s2297_s8 = sshll.u32 %s3047_s16, 4  ;;  %s2298_s8 = int_to_ptr.vmem [resolvable:$true] %s2297_s8 }
 0x2a9   :  { %p2987_p11 = scmp.lt.s32.totalorder %s2298_s8, %s2298_s8 }
 0x2b6   :  { %v2202_v34 = vpop.permute.xlu1 %2201 }
 0x2c2   :  { %v1444_v28 = vpop.xlane.xlu0 %1443 }
 0x2c3   :  { %2954 = vrcp.f32 %v1444_v28 }
 0x2cd   :  { %v2955_v31 = vpop.eup %2954 }
 0x2ce   :  { %v1446_v33 = vmul.f32 %v2955_v31, %v2953_v21  ;;  %v2650_v21 = vld [vmem:[%s3478_s15 + $0x18] sm:$0xff] }
 0x2d0   :  { %2805 = vmatmul.mubr.msk.f32.vlgmr.msra.gmra.mrb[10].mxu0 %vm1435_vm6, %v1446_v33  ;;  %v1779_v33 = vlaneseq }
 0x2d1   :  { %2912 = vmatpush3.bf16.msra.mxu0 %v3335_v32  ;;  %2819 = vmatprep.mubr.msk.f32.mxu0 %vm3043_vm0, %v3044_v17 }
 0x2d2   :  { %2913 = vmatprep.subr.bf16.mxu0 %v3042_v16  ;;  %v1780_v35 = vshrl.u32 %v1779_v33, 7 }
 0x2d5   :  { %2915 = vmatpush3.bf16.msra.mxu0 %v3345_v36 }
 0x2d6   :  { %2916 = vmatprep.subr.bf16.mxu0 %v3042_v16 }
 0x2d9   :  { %2918 = vmatpush3.bf16.msra.mxu0 %v3358_v39 }
 0x2da   :  { %2836 = vmatprep.subr.mxu0 %v3044_v17 }
 0x334   :  { %v1873_v40 = vpop.xlane.xlu0 %1872 }
 0x335   :  { %2956 = vrcp.f32 %v1873_v40 }
 0x33f   :  { %v2957_v44 = vpop.eup %2956 }
 0x340   :  { %v1875_v45 = vmul.f32 %v2957_v44, %v2951_v20  ;;  %v2649_v20 = vld [vmem:[%s3478_s15 + $0x10] sm:$0xff] }
 0x341   :  { %v2938_v22 = vpack.c.bf16 %v2650_v21, %v2649_v20 }
 0x342   :  { %1877 = vrot.lane.b32.xlu0 %v1875_v45, %s3045_s6 }
 0x3a3   :  { %v1521_v49 = vpop.f32.mrb[10].mxu0 }
 0x3a4   :  { %v1525_v50 = vmul.f32 %v1521_v49, %v1207_v48  ;;  %v2806_v51 = vpop.f32.mrb[11].mxu0 }
 0x3a6   :  { %2820 = vmatmul.mubr.msk.f32.vlgmr.msra.gmra.mrb[12].mxu0 %vm1532_vm8, %v1525_v50 }
 0x3a7   :  { %2838 = vmatprep.mubr.msk.f32.mxu0 %vm3043_vm0, %v3044_v17 }
 0x3b4   :  { %v1878_v62 = vpop.permute.xlu0 %1877 }
 0x479   :  { %v1602_v52 = vpop.f32.mrb[12].mxu0 }
 0x47a   :  { %v2821_v53 = vpop.f32.mrb[13].mxu0  ;;  %2827 = vmatmul.mubr.msk.f32.vlgmr.msra.gmra.mrb[4].mxu1 %vm878_vm1, %v1602_v52 }
 0x47b   :  { %2833 = vmatprep.mubr.msk.f32.mxu1 %vm3043_vm0, %v3044_v17  ;;  %2924 = vmatpush3.bf16.msra.mxu1 %v2923_v56 }
 0x47c   :  { %2841 = vmatprep.subr.mxu1 %v3044_v17 }
 0x54d   :  { %v1684_v58 = vpop.f32.mrb[4].mxu1 }
 0x54e   :  { %v1685_v59 = vadd.f32 %v2635_v57, %v1684_v58  ;;  %v2828_v60 = vpop.f32.mrb[5].mxu1 }
 0x550   :  { %v1688_v61 = vmax.f32 %v1685_v59, 0.0 }
 0x552   :  { %2834 = vmatmul.mubr.msk.f32.vlgmr.msra.gmra.mrb[6].mxu1 %vm878_vm1, %v1688_v61 }
 0x553   :  { %2842 = vmatpush3.msk.msra.mxu1 %vm1451_vm7, %v3323_v23  ;;  %2843 = vmatprep.mubr.msk.f32.mxu1 %vm3043_vm0, %v3044_v17 }
 0x554   :  { %2934 = vmatprep.subr.bf16.mxu1 %v3042_v16 }
 0x556   :  { %2844 = vmatmul.mubr.msk.f32.vlgmr.msra.gmra.mrb[8].mxu1 %vm1435_vm6, %v1878_v62 }
 0x557   :  { %2865 = vmatprep.mubr.msk.f32.mxu1 %vm3043_vm0, %v3044_v17  ;;  %2936 = vmatpush3.bf16.msra.mxu1 %v2935_v13 }
 0x558   :  { %2937 = vmatprep.subr.bf16.mxu1 %v3042_v16 }
 0x625   :  { %v1767_v3 = vpop.f32.mrb[6].mxu1 }
 0x626   :  { %v1768_v4 = vadd.f32 %v2637_v2, %v1767_v3  ;;  %v2835_v5 = vpop.f32.mrb[7].mxu1 }
 0x628   :  { %v1771_v6 = vmax.f32 %v1768_v4, 0.0 }
 0x629   :  { %v1947_v7 = vpop.f32.mrb[8].mxu1 }
 0x62a   :  { %2837 = vmatpush3.xpose.msk.msra.mxu0 %vm1783_vm9, %v1771_v6  ;;  %v2845_v8 = vpop.f32.mrb[9].mxu1  ;;  %v1951_v10 = vmul.f32 %v1947_v7, %v1207_v48 }
 0x62b   :  { %2925 = vmatprep.subr.bf16.mxu0 %v3042_v16 }
 0x62d   :  { %2839 = vmatmul.mubr.msk.f32.vlgmr.msra.gmra.mrb[14].mxu0 %vm1783_vm9, %v1772_v9 }
 0x62e   :  { %2927 = vmatpush3.bf16.msra.mxu0 %v3335_v32  ;;  %2858 = vmatprep.mubr.msk.f32.mxu0 %vm3043_vm0, %v3044_v17  ;;  %v2654_v32 = vld [vmem:[%s3480_s17 + $0x1] sm:$0x1]  ;;  %s2982_s17 = scalar_lea.vmem %s2298_s8, 32 }
 0x62f   :  { %2928 = vmatprep.subr.bf16.mxu0 %v3042_v16  ;;  %p2983_p10 = scmp.ne.s32.totalorder %s2298_s8, %s2982_s17  ;;  %p2988_p12 = scmp.lt.s32.totalorder %s2982_s17, %s2982_s17 }
 0x631   :  { %p2989_p13 = por %p2988_p12, %p2987_p11 }
 0x632   :  { %2930 = vmatpush3.bf16.msra.mxu0 %v3345_v36  ;;  %v1777_v36 = vpop.permute.xlu1 %1776 }
 0x633   :  { %2931 = vmatprep.subr.bf16.mxu0 %v3042_v16  ;;  %v2647_v16 = vld [vmem:[%s3496_s1 + $0x1] ss:$0 sm:$0xff]  ;;  %p2990_p0 = pnand %p2989_p13, %p2983_p10 }
 0x636   :  { %2933 = vmatpush3.bf16.msra.mxu0 %v3358_v39 }
 0x639   :  { %2859 = vmatmul.mubr.msk.f32.vlgmr.msra.gmra.mrb[16].mxu0 %vm1532_vm8, %v1951_v10 }
 0x700   :  { %v1856_v14 = vpop.f32.mrb[14].mxu0 }
 0x701   :  { %v2840_v15 = vpop.f32.mrb[15].mxu0 }
 0x70c   :  { %v2021_v18 = vpop.f32.mrb[16].mxu0 }
 0x70d   :  { %v2860_v19 = vpop.f32.mrb[17].mxu0  ;;  %2866 = vmatmul.mubr.msk.f32.vlgmr.msra.gmra.mrb[10].mxu1 %vm878_vm1, %v2021_v18 }
 0x70e   :  { %2872 = vmatprep.mubr.msk.f32.mxu1 %vm3043_vm0, %v3044_v17  ;;  %2939 = vmatpush3.bf16.msra.mxu1 %v2938_v22 }
 0x70f   :  { %2875 = vmatprep.subr.mxu1 %v3044_v17 }
 0x7e0   :  { %v2105_v23 = vpop.f32.mrb[10].mxu1 }
 0x7e1   :  { %v2106_v24 = vadd.f32 %v2647_v16, %v2105_v23  ;;  %v2867_v25 = vpop.f32.mrb[11].mxu1 }
 0x7e3   :  { %v2109_v26 = vmax.f32 %v2106_v24, 0.0 }
 0x7e5   :  { %2873 = vmatmul.mubr.msk.f32.vlgmr.msra.gmra.mrb[12].mxu1 %vm878_vm1, %v2109_v26 }
 0x7e6   :  { %2877 = vmatprep.mubr.msk.f32.mxu1 %vm3043_vm0, %v3044_v17  ;;  %v1781_v17 = vsub.s32 0, %v1780_v35 }
 0x7e8   :  { %v2207_v37 = vrot.slane %v2202_v34, %v1781_v17  ;;  %v1782_v38 = vrot.slane %v1777_v36, %v1781_v17 }
 0x7ea   :  { %v1857_v42 = vadd.f32 %v1856_v14, %v1782_v38 }
 0x8b8   :  { %v2190_v28 = vpop.f32.mrb[12].mxu1 }
 0x8b9   :  { %v2191_v29 = vadd.f32 %v2652_v27, %v2190_v28  ;;  %v2874_v30 = vpop.f32.mrb[13].mxu1 }
 0x8bb   :  { %v2194_v31 = vmax.f32 %v2191_v29, 0.0 }
 0x8bd   :  { %2876 = vmatpush3.xpose.msk.msra.mxu1 %vm1783_vm9, %v2194_v31 }
 0x8c0   :  { %2878 = vmatmul.mubr.msk.f32.vlgmr.msra.gmra.mrb[14].mxu1 %vm1783_vm9, %v2654_v32 }
 0x993   :  { %v2280_v39 = vpop.f32.mrb[14].mxu1 }
 0x994   :  { %v2281_v40 = vadd.f32 %v2280_v39, %v2207_v37  ;;  %v2879_v41 = vpop.f32.mrb[15].mxu1 }
 0x996   :  { %v2285_v43 = vrot.slane %v2281_v40, 7 }
 0x998   :  { %v2288_v44 = vsel %vm2287_vm10, %v1857_v42, %v2285_v43 }
 0x999   :  { %2290 = vst.msk [vmem:[#allocation8] sm:$0x3] %vm2289_vm11, %v2288_v44 }
 0x99a   :  { %2993 = shalt.err (!%p2990_p0)
}
 0x99b   :  { %s2994_s6 = scalar_lea.hbm %s3482_s19, 32 }
 0x99c   :  { %p2995_p1 = scmp.ne.s32.totalorder %s3482_s19, %s2994_s6  ;;  %p2998_p2 = scmp.lt.u32.totalorder %s2994_s6, %s3482_s19 }
 0x99e   :  { %p3000_p3 = pnand %p2998_p2, %p2995_p1 }
 0x9a0   :  { %3003 = shalt.err (!%p3000_p3)
}
 0x9a1   :  { %2300 = dma.vmem_to_hbm [thread:$0]  %s2298_s8, 32, %s3482_s19, [#allocation9]  }
 0x9a2   :  { %3038 = dma.done.wait [#allocation9], 32  }
 0x9a3   :  { %3039 = vsyncadd [#allocation9], 4294967264 }
 0x9a4   :  { %2304 = vsyncpa [#allocation9], 1 }
 0x9a5   :  { %2305 = vsyncmov [#allocation4] }
 0x9a8   :  { %s2306_s28 = vpop.sfrf %2305 }
 0x9a9   :  { %p2658_p4 = scmp.ne.s32.totalorder %s2306_s28, 0 }
 0x9ab   :  { %2310 = shalt.err (%p2658_p4)  }
 0x9ac   :  { %2312 = vsyncmov [#allocation4 + $0x1] }
 0x9af   :  { %s2313_s5 = vpop.sfrf %2312 }
 0x9b0   :  { %p2659_p5 = scmp.ne.s32.totalorder %s2313_s5, 0 }
 0x9b2   :  { %2317 = shalt.err (%p2659_p5)  }
 0x9b3   :  { %2319 = vsyncmov [#allocation4 + $0x2] }
 0x9b6   :  { %s2320_s9 = vpop.sfrf %2319 }
 0x9b7   :  { %p2660_p6 = scmp.ne.s32.totalorder %s2320_s9, 0 }
 0x9b9   :  { %2324 = shalt.err (%p2660_p6)  }
 0x9ba   :  { %2326 = vsyncmov [#allocation4 + $0x3] }
 0x9bd   :  { %s2327_s30 = vpop.sfrf %2326 }
 0x9be   :  { %p2661_p7 = scmp.ne.s32.totalorder %s2327_s30, 0 }
 0x9c0   :  { %2331 = shalt.err (%p2661_p7)  }
 0x9c1   :  { %2333 = vsyncmov [#allocation4 + $0x4] }
 0x9c4   :  { %s2334_s19 = vpop.sfrf %2333 }
 0x9c5   :  { %p2662_p8 = scmp.ne.s32.totalorder %s2334_s19, 0 }
 0x9c7   :  { %2338 = shalt.err (%p2662_p8)  }
 0x9c8   :  { %2340 = vsyncmov [#allocation4 + $0x5] }
 0x9cb   :  { %s2341_s18 = vpop.sfrf %2340 }
 0x9cc   :  { %p2663_p9 = scmp.ne.s32.totalorder %s2341_s18, 0 }
 0x9ce   :  { %2345 = shalt.err (%p2663_p9)  }
 0x9cf   :  { %2347 = vsyncmov [#allocation4 + $0x6] }
 0x9d2   :  { %s2348_s29 = vpop.sfrf %2347 }
 0x9d3   :  { %p2664_p10 = scmp.ne.s32.totalorder %s2348_s29, 0 }
 0x9d5   :  { %2352 = shalt.err (%p2664_p10)  }
 0x9d6   :  { %2354 = vsyncmov [#allocation4 + $0x7] }
 0x9d9   :  { %s2355_s14 = vpop.sfrf %2354 }
 0x9da   :  { %p2665_p11 = scmp.ne.s32.totalorder %s2355_s14, 0 }
 0x9dc   :  { %2359 = shalt.err (%p2665_p11)  }
 0x9dd   :  { %2361 = vsyncmov [#allocation4 + $0x8] }
 0x9e0   :  { %s2362_s0 = vpop.sfrf %2361 }
 0x9e1   :  { %p2666_p12 = scmp.ne.s32.totalorder %s2362_s0, 0 }
 0x9e3   :  { %2366 = shalt.err (%p2666_p12)  }
 0x9e4   :  { %2368 = vsyncmov [#allocation4 + $0x9] }
 0x9e7   :  { %s2369_s20 = vpop.sfrf %2368 }
 0x9e8   :  { %p2667_p13 = scmp.ne.s32.totalorder %s2369_s20, 0 }
 0x9ea   :  { %2373 = shalt.err (%p2667_p13)  }
 0x9eb   :  { %2375 = vsyncmov [#allocation4 + $0xa] }
 0x9ee   :  { %s2376_s21 = vpop.sfrf %2375 }
 0x9ef   :  { %p2668_p0 = scmp.ne.s32.totalorder %s2376_s21, 0 }
 0x9f1   :  { %2380 = shalt.err (%p2668_p0)  }
 0x9f2   :  { %2382 = vsyncmov [#allocation4 + $0xb] }
 0x9f5   :  { %s2383_s2 = vpop.sfrf %2382 }
 0x9f6   :  { %p2669_p1 = scmp.ne.s32.totalorder %s2383_s2, 0 }
 0x9f8   :  { %2387 = shalt.err (%p2669_p1)  }
 0x9f9   :  { %2389 = vsyncmov [#allocation4 + $0xc] }
 0x9fc   :  { %s2390_s22 = vpop.sfrf %2389 }
 0x9fd   :  { %p2670_p2 = scmp.ne.s32.totalorder %s2390_s22, 0 }
 0x9ff   :  { %2394 = shalt.err (%p2670_p2)  }
 0xa00   :  { %2396 = vsyncmov [#allocation4 + $0xd] }
 0xa03   :  { %s2397_s13 = vpop.sfrf %2396 }
 0xa04   :  { %p2671_p3 = scmp.ne.s32.totalorder %s2397_s13, 0 }
 0xa06   :  { %2401 = shalt.err (%p2671_p3)  }
 0xa07   :  { %2403 = vsyncmov [#allocation4 + $0xe] }
 0xa0a   :  { %s2404_s3 = vpop.sfrf %2403 }
 0xa0b   :  { %p2672_p4 = scmp.ne.s32.totalorder %s2404_s3, 0 }
 0xa0d   :  { %2408 = shalt.err (%p2672_p4)  }
 0xa0e   :  { %2410 = vsyncmov [#allocation4 + $0xf] }
 0xa11   :  { %s2411_s12 = vpop.sfrf %2410 }
 0xa12   :  { %p2673_p5 = scmp.ne.s32.totalorder %s2411_s12, 0 }
 0xa14   :  { %2415 = shalt.err (%p2673_p5)  }

</bundles_post_ra>
